<compile_context>
chip_gen: v7x
topology: tpu7x:2x2x1
jax: 0.10.0
libtpu: 0.0.40
codegen_flags: <defaults>
</compile_context>

<pallas_src>
import functools

import jax
import jax.numpy as jnp
import numpy as np
from jax.experimental import pallas as pl
from jax.experimental.pallas import tpu as pltpu

EPS = 1e-6
_BN_EPS = 1e-5


# ---------------------------------------------------------------------------
# Tiling / VMEM helpers
# ---------------------------------------------------------------------------
def _vmem_budget_bytes():
    """Generation-aware VMEM budget: ~96 MiB on 128-MiB parts (v5e/v6e), ~40 MiB on v7x."""
    try:
        cap = int(pltpu.get_tpu_info().vmem_capacity_bytes)
    except Exception:  # conservative fallback if the query is unavailable
        cap = 64 * 1024 * 1024
    if cap > 80 * 1024 * 1024:
        return 96 * 1024 * 1024
    return 40 * 1024 * 1024


def _choose_tiling(n, bytes_per_lane, fixed_bytes, vmem_budget, batch):
    """Pick (lane tile TN, padded N).

    TN is a multiple of 128 (or the full extent for tiny N), sized so the
    double-buffered per-tile footprint fits the VMEM budget while keeping
    grid = batch * (N_pad / TN) >= 4 (>= ~2 steps per TensorCore on dual-TC parts).
    """
    if n <= 512 and n % 128 != 0:
        return n, n                                    # tiny / odd extent: one full tile
    n_pad = -(-n // 128) * 128
    avail = max(vmem_budget - fixed_bytes, 2 * 128 * bytes_per_lane)
    max_tn = max(128, (avail // (2 * bytes_per_lane)) // 128 * 128)
    min_tiles = max(1, -(-4 // batch))
    cap_tn = max(128, (n_pad // min_tiles) // 128 * 128)
    tn = int(min(max_tn, cap_tn, 8192))
    n_pad = -(-n_pad // tn) * tn
    return tn, n_pad


# ---------------------------------------------------------------------------
# Pallas kernels
# ---------------------------------------------------------------------------
def _vn_dual_full_kernel(xf_ref, w_ref, b_ref, proj_ref, p_ref, d_ref, n_ref):
    """Non-equivariant path: both p and d linear paths + |p| from one stacked matmul.

    xf_ref:   [1, C_in*3, TN]      flat x (lane tile of N)
    w_ref:    [4*C_out*3, C_in*3]  [kron(Wf,I3); W_dense_lin; kron(Wd,I3); W_dense_dir]
    b_ref:    [C_out*3, 1]         dense_lin bias (column: varies along sublanes)
    proj_ref: [1, 3, TN]
    p_ref/d_ref: [1, C_out*3, TN]  storage dtype (bf16 by default)
    n_ref:    [1, C_out, TN] f32   per-channel 3-vector norm of p (+EPS)
    """
    c3, tn = p_ref.shape[1], p_ref.shape[2]
    c_out = c3 // 3

    y = jnp.dot(w_ref[...], xf_ref[0], preferred_element_type=jnp.float32)   # [4*c3, TN]

    # Broadcast proj over the C_out channel groups ONCE (3 -> c3 rows, small tensor);
    # the big matmul outputs never get re-laid-out.
    proj_b = jnp.broadcast_to(proj_ref[0].astype(jnp.float32)[None, :, :],
                              (c_out, 3, tn)).reshape(c3, tn)

    p = y[0:c3] + (y[c3:2 * c3] + b_ref[...]) * proj_b
    d = y[2 * c3:3 * c3] + y[3 * c3:4 * c3] * proj_b

    n_ref[0] = jnp.sqrt(jnp.square(p).reshape(c_out, 3, tn).sum(axis=1)) + EPS
    p_ref[0] = p.astype(p_ref.dtype)
    d_ref[0] = d.astype(d_ref.dtype)


def _vn_dual_equiv_kernel(xf_ref, w_ref, p_ref, d_ref, n_ref):
    """Equivariant path: p = W_feat x, d = W_dir x (channel mixing only) + |p|.

    xf_ref: [1, C_in*3, TN]       flat x
    w_ref:  [2*C_out*3, C_in*3]   [kron(W_feat, I3); kron(W_dir, I3)]
    """
    c3, tn = p_ref.shape[1], p_ref.shape[2]
    c_out = c3 // 3
    y = jnp.dot(w_ref[...], xf_ref[0], preferred_element_type=jnp.float32)   # [2*c3, TN]
    p = y[0:c3]
    d = y[c3:2 * c3]
    n_ref[0] = jnp.sqrt(jnp.square(p).reshape(c_out, 3, tn).sum(axis=1)) + EPS
    p_ref[0] = p.astype(p_ref.dtype)
    d_ref[0] = d.astype(d_ref.dtype)


def _bn_leaky_kernel(p_ref, d_ref, n_ref, mean_ref, invstd_ref, o_ref, *, negative_slope):
    """Fused VNBatchNorm apply + VN-LeakyReLU.

    p_ref/d_ref: [1, C_out*3, TN] (storage dtype)
    n_ref:       [1, C_out, TN] f32  (vector norm of p, includes +EPS)
    mean_ref / invstd_ref: [C_out, 1] f32 per-channel batch statistics
    o_ref:       [1, C_out*3, TN] f32
    """
    c3, tn = o_ref.shape[1], o_ref.shape[2]
    c_out = c3 // 3

    norm = n_ref[0]                                                    # [C_out, TN]
    scale_c = (norm - mean_ref[...]) * invstd_ref[...] / norm          # norm_bn / norm
    scale_b = jnp.broadcast_to(scale_c[:, None, :], (c_out, 3, tn)).reshape(c3, tn)

    p = p_ref[0].astype(jnp.float32) * scale_b                         # BN applied
    d = d_ref[0].astype(jnp.float32)

    dot_c = (p * d).reshape(c_out, 3, tn).sum(axis=1)                  # [C_out, TN]
    dsq_c = (d * d).reshape(c_out, 3, tn).sum(axis=1)
    # x_out = p - (1 - slope) * [dot < 0] * dot / (|d|^2 + EPS) * d   (== torch formula)
    coef_c = jnp.where(dot_c >= 0.0, 0.0, dot_c / (dsq_c + EPS)) * (1.0 - negative_slope)
    coef_b = jnp.broadcast_to(coef_c[:, None, :], (c_out, 3, tn)).reshape(c3, tn)

    o_ref[0] = (p - coef_b * d).astype(o_ref.dtype)


# ---------------------------------------------------------------------------
# Lie-bracket regularizer (detached whole-batch reduction; kept in XLA)
# ---------------------------------------------------------------------------
def _create_gen(channels):
    genx = jnp.array([[0., 0., 0.], [0., 0., -1.], [0., 1., 0.]], jnp.float32)
    geny = jnp.array([[0., 0., 1.], [0., 0., 0.], [-1., 0., 0.]], jnp.float32)
    genz = jnp.array([[0., -1., 0.], [1., 0., 0.], [0., 0., 0.]], jnp.float32)
    eye = jnp.eye(channels, dtype=jnp.float32)
    in_bl = jnp.concatenate([jnp.kron(eye, g) for g in (genx, geny, genz)], axis=0)
    return in_bl.T                                                      # [3*C, 9*C]


def _lie_bracket_penalty_fused(x, w, b, c_in, c_out):
    """||W(Ax) - A(Wx)||^2 and ||Wx||^2 for dense_lin, via a precomputed bracket matrix.

    Algebraically identical to the direct PyTorch formulation, but the generator
    matrices are contracted against W once, so the per-point work is a single
    [B*N, 3*C_in] @ [3*C_in, 9*C_out] matmul (no [B*N, 3, 3*C] permuted temporaries).
    """
    B, _, _, N = x.shape
    F, G = 3 * c_in, 3 * c_out
    gin = _create_gen(c_in).reshape(F, F, 3)              # [g, r, a]
    gout = _create_gen(c_out).reshape(G, G, 3)            # [h, q, a]
    a1 = jnp.einsum('gra,qr->gqa', gin, w)                # W(Ax) coefficients
    a2 = jnp.einsum('hg,hqa->gqa', w, gout)               # A(Wx) coefficients
    m = (a1 - a2).reshape(F, 3 * G)
    c = (b[:, None] - jnp.einsum('h,hqa->qa', b, gout)).reshape(3 * G)
    xt = x.reshape(B, F, N)
    diff = jnp.einsum('bgn,gk->bnk', xt, m) + c           # [B, N, 9*C_out]
    wx = jnp.einsum('bgn,hg->bnh', xt, w) + b             # [B, N, 3*C_out]
    return jnp.sum(diff * diff), jnp.sum(wx * wx)


def _lie_bracket_penalty_direct(x, w, b, c_in, c_out):
    """Faithful transcription of the PyTorch penalty (reference only)."""
    B, _, _, N = x.shape
    gen_in, gen_out = _create_gen(c_in), _create_gen(c_out)
    addw = x.reshape(B, c_in * 3, N).transpose(0, 2, 1)                   # [B, N, 3C_in]
    xa = (addw @ gen_in).reshape(-1, c_in * 3, 3).transpose(0, 2, 1)      # [B*N, 3, 3C_in]
    wa = xa @ w.T + b
    wx = addw @ w.T + b
    aw = (wx @ gen_out).reshape(-1, c_out * 3, 3).transpose(0, 2, 1)
    return jnp.sum(jnp.square(wa - aw)), jnp.sum(jnp.square(wx))


# ---------------------------------------------------------------------------
# Full forward (Pallas)
# ---------------------------------------------------------------------------
def vn_linear_leaky_relu_dual(x, proj, params, *, equiv, negative_slope=0.2,
                              compute_dtype=jnp.bfloat16):
    """Forward of VNLinearLeakyReLU_Dual (share_nonlinearity=False, 4-D input)."""
    w_feat = params["map_to_feat.weight"]
    w_dir = params["map_to_dir.weight"]
    w_dl = params["dense_lin.weight"]
    b_dl = params["dense_lin.bias"]
    w_dd = params["dense_map_to_dir.weight"]

    B, C_in, three, N = x.shape
    assert three == 3
    C_out = w_feat.shape[0]
    c3, cin3 = C_out * 3, C_in * 3

    in_b = jnp.dtype(compute_dtype).itemsize
    out_b = in_b                       # p/d stored in compute_dtype
    budget = _vmem_budget_bytes()
    per_lane = max(                    # per-lane bytes: pipelined I/O + in-kernel f32 temps
        2 * ((cin3 + 3) * in_b + 2 * c3 * out_b + C_out * 4) + (7 * c3 + C_out) * 4,
        2 * (2 * c3 * out_b + C_out * 4 + c3 * 4) + 6 * c3 * 4)
    fixed = 4 * (4 * c3) * cin3 * in_b + (2 << 20)
    tn, n_pad = _choose_tiling(N, per_lane, fixed, budget, B)

    cp = pltpu.CompilerParams(dimension_semantics=("parallel", "parallel"),
                              vmem_limit_bytes=budget)
    grid = (B, n_pad // tn)

    x_flat = x.reshape(B, cin3, N).astype(compute_dtype)   # torch.flatten(x, 1, 2)
    if n_pad != N:
        x_flat = jnp.pad(x_flat, ((0, 0), (0, 0), (0, n_pad - N)))

    eye3 = jnp.eye(3, dtype=jnp.float32)
    out_pd = jax.ShapeDtypeStruct((B, c3, n_pad), compute_dtype)
    out_n = jax.ShapeDtypeStruct((B, C_out, n_pad), jnp.float32)
    pd_spec = pl.BlockSpec((1, c3, tn), lambda b, t: (b, 0, t))
    n_spec = pl.BlockSpec((1, C_out, tn), lambda b, t: (b, 0, t))
    x_spec = pl.BlockSpec((1, cin3, tn), lambda b, t: (b, 0, t))

    if equiv:
        # TODO(synk): for large C_in/C_out, drive the MXU with W[C_out,C_in] on a
        # [C_in, 3*TN] view instead of kron(W, I3) (2/3 of the K rows are zeros).
        w_stack = jnp.concatenate(
            [jnp.kron(w_feat, eye3), jnp.kron(w_dir, eye3)], axis=0).astype(compute_dtype)
        p, d, pnorm = pl.pallas_call(
            _vn_dual_equiv_kernel,
            out_shape=(out_pd, out_pd, out_n),
            grid=grid,
            in_specs=[x_spec, pl.BlockSpec((2 * c3, cin3), lambda b, t: (0, 0))],
            out_specs=(pd_spec, pd_spec, n_spec),
            compiler_params=cp,
        )(x_flat, w_stack)
        ld_norm = jnp.asarray(0.0, jnp.float32)
        norm = jnp.asarray(0.0, jnp.float32)
    else:
        if proj.ndim == 4:
            if proj.shape[1] != 1:
                raise NotImplementedError("proj must broadcast over the channel dim")
            proj3 = jnp.broadcast_to(proj, (B, 1, 3, N)).reshape(B, 3, N)
        else:
            proj3 = jnp.broadcast_to(proj, (B, 3, N))
        proj3 = proj3.astype(compute_dtype)
        if n_pad != N:
            proj3 = jnp.pad(proj3, ((0, 0), (0, 0), (0, n_pad - N)))

        w_all = jnp.concatenate(
            [jnp.kron(w_feat, eye3), w_dl, jnp.kron(w_dir, eye3), w_dd],
            axis=0).astype(compute_dtype)                        # [4*c3, C_in*3]
        b_col = b_dl.reshape(c3, 1).astype(jnp.float32)

        p, d, pnorm = pl.pallas_call(
            _vn_dual_full_kernel,
            out_shape=(out_pd, out_pd, out_n),
            grid=grid,
            in_specs=[x_spec,
                      pl.BlockSpec((4 * c3, cin3), lambda b, t: (0, 0)),
                      pl.BlockSpec((c3, 1), lambda b, t: (0, 0)),
                      pl.BlockSpec((1, 3, tn), lambda b, t: (b, 0, t))],
            out_specs=(pd_spec, pd_spec, n_spec),
            compiler_params=cp,
        )(x_flat, w_all, b_col, proj3)

        # Lie-bracket regularizer (detached in torch; the p-branch term is recomputed
        # verbatim in the d-branch, hence the exact 2x).
        # TODO(synk): could be accumulated inside the main kernel (x is already resident
        # per tile) at the cost of per-tile scalar outputs; kept as one fused XLA einsum.
        ld, nrm = _lie_bracket_penalty_fused(x, w_dl, b_dl, C_in, C_out)
        ld_norm, norm = 2.0 * ld, 2.0 * nrm

    # BatchNorm statistics: global per-channel reduction over the tiny [B, C_out, N]
    # norm array produced by the main kernel (p itself is never re-read from HBM).
    pn_valid = pnorm if n_pad == N else pnorm[:, :, :N]
    mean = jnp.mean(pn_valid, axis=(0, 2))
    var = jnp.mean(jnp.square(pn_valid - mean[None, :, None]), axis=(0, 2))
    invstd = 1.0 / jnp.sqrt(var + _BN_EPS)

    # Fused BN-apply + VN-LeakyReLU epilogue (single pass over p, d, norm).
    x_out = pl.pallas_call(
        functools.partial(_bn_leaky_kernel, negative_slope=float(negative_slope)),
        out_shape=jax.ShapeDtypeStruct((B, c3, n_pad), jnp.float32),
        grid=grid,
        in_specs=[pd_spec, pd_spec, n_spec,
                  pl.BlockSpec((C_out, 1), lambda b, t: (0, 0)),
                  pl.BlockSpec((C_out, 1), lambda b, t: (0, 0))],
        out_specs=pd_spec,
        compiler_params=cp,
    )(p, d, pnorm, mean.reshape(C_out, 1), invstd.reshape(C_out, 1))

    if n_pad != N:
        x_out = x_out[:, :, :N]
    return x_out.reshape(B, C_out, 3, N), ld_norm, norm


# ---------------------------------------------------------------------------
# Pure-JAX reference (mirrors the PyTorch ops, no Pallas)
# ---------------------------------------------------------------------------
def _vn_batchnorm_ref(p):
    norm = jnp.sqrt(jnp.sum(p * p, axis=2)) + EPS                 # [B, C, N]
    mean = jnp.mean(norm, axis=(0, 2), keepdims=True)
    var = jnp.mean(jnp.square(norm - mean), axis=(0, 2), keepdims=True)
    norm_bn = (norm - mean) / jnp.sqrt(var + _BN_EPS)
    return p / norm[:, :, None, :] * norm_bn[:, :, None, :]


def _vn_leaky_relu_ref(p, d, negative_slope):
    dotprod = jnp.sum(p * d, axis=2, keepdims=True)
    mask = (dotprod >= 0).astype(p.dtype)
    d_norm_sq = jnp.sum(d * d, axis=2, keepdims=True)
    return (negative_slope * p
            + (1.0 - negative_slope)
            * (mask * p + (1.0 - mask) * (p - dotprod / (d_norm_sq + EPS) * d)))


def vn_linear_leaky_relu_dual_ref(x, proj, params, *, equiv, negative_slope=0.2):
    w_feat = params["map_to_feat.weight"]
    w_dir = params["map_to_dir.weight"]
    w_dl = params["dense_lin.weight"]
    b_dl = params["dense_lin.bias"]
    w_dd = params["dense_map_to_dir.weight"]
    B, c_in, _, N = x.shape
    c_out = w_feat.shape[0]
    x_flat = x.reshape(B, c_in * 3, N)

    def map_path(w):
        return jnp.einsum("oc,bcan->boan", w, x)

    def dense_path(w, b):
        out = jnp.einsum("gf,bfn->bgn", w, x_flat)
        if b is not None:
            out = out + b[None, :, None]
        return out.reshape(B, c_out, 3, N)

    if equiv:
        p, d = map_path(w_feat), map_path(w_dir)
        ld_norm = jnp.asarray(0.0, jnp.float32)
        norm = jnp.asarray(0.0, jnp.float32)
    else:
        p = map_path(w_feat) + proj * dense_path(w_dl, b_dl)
        d = map_path(w_dir) + proj * dense_path(w_dd, None)
        ld, nrm = _lie_bracket_penalty_direct(x, w_dl, b_dl, c_in, c_out)
        ld_norm, norm = 2.0 * ld, 2.0 * nrm

    p = _vn_batchnorm_ref(p)
    x_out = _vn_leaky_relu_ref(p, d, negative_slope)
    return x_out, ld_norm, norm


# ---------------------------------------------------------------------------
# Main
# ---------------------------------------------------------------------------
if __name__ == "__main__":
    B, C_in, C_out, N = 2, 4, 8, 16

    key = jax.random.PRNGKey(0)
    kx, kp, k1, k2, k3, k4, k5 = jax.random.split(key, 7)

    x = jax.random.normal(kx, (B, C_in, 3, N), dtype=jnp.float32)
    proj = jax.random.normal(kp, (B, 1, 3, N), dtype=jnp.float32)

    bm = 1.0 / np.sqrt(C_in)
    bd = 1.0 / np.sqrt(C_in * 3)
    params = {
        "map_to_feat.weight": jax.random.uniform(k1, (C_out, C_in), jnp.float32, -bm, bm),
        "map_to_dir.weight": jax.random.uniform(k2, (C_out, C_in), jnp.float32, -bm, bm),
        "dense_lin.weight": jax.random.uniform(k3, (C_out * 3, C_in * 3), jnp.float32, -bd, bd),
        "dense_lin.bias": jax.random.uniform(k4, (C_out * 3,), jnp.float32, -bd, bd),
        "dense_map_to_dir.weight": jax.random.uniform(k5, (C_out * 3, C_in * 3), jnp.float32,
                                                      -bd, bd),
    }

    run_f32 = jax.jit(functools.partial(vn_linear_leaky_relu_dual, equiv=False,
                                        compute_dtype=jnp.float32))
    run_bf16 = jax.jit(functools.partial(vn_linear_leaky_relu_dual, equiv=False,
                                         compute_dtype=jnp.bfloat16))
    run_eq = jax.jit(functools.partial(vn_linear_leaky_relu_dual, equiv=True,
                                       compute_dtype=jnp.bfloat16))

    out32, ld32, nrm32 = jax.block_until_ready(run_f32(x, proj, params))
    out16, ld16, nrm16 = jax.block_until_ready(run_bf16(x, proj, params))
    oute, lde, nrme = jax.block_until_ready(run_eq(x, proj, params))

    ref_f, ld_r, nrm_r = vn_linear_leaky_relu_dual_ref(x, proj, params, equiv=False)
    ref_e, _, _ = vn_linear_leaky_relu_dual_ref(x, proj, params, equiv=True)

    # f32 validation path (tight) and bf16 production path (storage-rounding tolerance).
    np.testing.assert_allclose(np.asarray(out32), np.asarray(ref_f), rtol=1e-4, atol=1e-4)
    np.testing.assert_allclose(np.asarray(out16), np.asarray(ref_f), rtol=5e-2, atol=5e-2)
    np.testing.assert_allclose(np.asarray(oute), np.asarray(ref_e), rtol=5e-2, atol=5e-2)
    np.testing.assert_allclose(float(ld32), float(ld_r), rtol=1e-4)
    np.testing.assert_allclose(float(nrm32), float(nrm_r), rtol=1e-4)
    np.testing.assert_allclose(float(ld16), float(ld_r), rtol=1e-4)
    np.testing.assert_allclose(float(lde), 0.0)
    np.testing.assert_allclose(float(nrme), 0.0)

    print("KERNEL_OK")
</pallas_src>

<mosaic_0001>
module attributes {stable_mosaic.version = 11 : i64} {
  func.func @_vn_dual_full_kernel(%arg0: i32, %arg1: i32, %arg2: memref<1x12x16xf32, #tpu.memory_space<vmem>>, %arg3: memref<96x12xf32, #tpu.memory_space<vmem>>, %arg4: memref<24x1xf32, #tpu.memory_space<vmem>>, %arg5: memref<1x3x16xf32, #tpu.memory_space<vmem>>, %arg6: memref<1x24x16xf32, #tpu.memory_space<vmem>>, %arg7: memref<1x24x16xf32, #tpu.memory_space<vmem>>, %arg8: memref<1x8x16xf32, #tpu.memory_space<vmem>>) attributes {dimension_semantics = [#tpu.dimension_semantics<parallel>, #tpu.dimension_semantics<parallel>], iteration_bounds = array<i64: 2, 1>, scalar_prefetch = 0 : i64, scratch_operands = 0 : i64, tpu.core_type = #tpu.core_type<tc>, window_params = [{transform_indices = @transform_0, window_bounds = array<i64: 1, 12, 16>}, {pipeline_mode = #tpu.pipeline_mode<synchronous>, transform_indices = @transform_1, window_bounds = array<i64: 96, 12>}, {pipeline_mode = #tpu.pipeline_mode<synchronous>, transform_indices = @transform_2, window_bounds = array<i64: 24, 1>}, {transform_indices = @transform_3, window_bounds = array<i64: 1, 3, 16>}, {transform_indices = @transform_4, window_bounds = array<i64: 1, 24, 16>}, {transform_indices = @transform_5, window_bounds = array<i64: 1, 24, 16>}, {transform_indices = @transform_6, window_bounds = array<i64: 1, 8, 16>}]} {
    %c0 = arith.constant 0 : index
    %c0_0 = arith.constant 0 : index
    %0 = vector.load %arg3[%c0, %c0_0] : memref<96x12xf32, #tpu.memory_space<vmem>>, vector<96x12xf32>
    %c0_1 = arith.constant 0 : index
    %c0_2 = arith.constant 0 : index
    %c0_3 = arith.constant 0 : index
    %1 = vector.load %arg2[%c0_1, %c0_2, %c0_3] : memref<1x12x16xf32, #tpu.memory_space<vmem>>, vector<1x12x16xf32>
    %2 = vector.shape_cast %1 : vector<1x12x16xf32> to vector<12x16xf32>
    %cst = arith.constant dense<0.000000e+00> : vector<96x16xf32>
    %3 = tpu.matmul %0, %2, %cst {dimension_numbers = #tpu.dot_dimension_numbers<[1], [0], [0], [1], [0, 0, 1, 1], [], []>} : vector<96x12xf32>, vector<12x16xf32>, vector<96x16xf32> -> vector<96x16xf32>
    %c0_4 = arith.constant 0 : index
    %c0_5 = arith.constant 0 : index
    %c0_6 = arith.constant 0 : index
    %4 = vector.load %arg5[%c0_4, %c0_5, %c0_6] : memref<1x3x16xf32, #tpu.memory_space<vmem>>, vector<1x3x16xf32>
    %5 = vector.shape_cast %4 : vector<1x3x16xf32> to vector<3x16xf32>
    %6 = vector.shape_cast %5 : vector<3x16xf32> to vector<1x3x16xf32>
    %7 = vector.shape_cast %6 : vector<1x3x16xf32> to vector<1x3x16xf32>
    %8 = vector.broadcast %7 : vector<1x3x16xf32> to vector<8x3x16xf32>
    %9 = vector.shape_cast %8 : vector<8x3x16xf32> to vector<24x16xf32>
    %10 = vector.extract_strided_slice %3 {offsets = [0, 0], sizes = [24, 16], strides = [1, 1]} : vector<96x16xf32> to vector<24x16xf32>
    %11 = vector.extract_strided_slice %3 {offsets = [24, 0], sizes = [24, 16], strides = [1, 1]} : vector<96x16xf32> to vector<24x16xf32>
    %c0_7 = arith.constant 0 : index
    %c0_8 = arith.constant 0 : index
    %12 = vector.load %arg4[%c0_7, %c0_8] : memref<24x1xf32, #tpu.memory_space<vmem>>, vector<24x1xf32>
    %13 = vector.broadcast %12 : vector<24x1xf32> to vector<24x16xf32>
    %14 = arith.addf %11, %13 : vector<24x16xf32>
    %15 = arith.mulf %14, %9 : vector<24x16xf32>
    %16 = arith.addf %10, %15 : vector<24x16xf32>
    %17 = vector.extract_strided_slice %3 {offsets = [48, 0], sizes = [24, 16], strides = [1, 1]} : vector<96x16xf32> to vector<24x16xf32>
    %18 = vector.extract_strided_slice %3 {offsets = [72, 0], sizes = [24, 16], strides = [1, 1]} : vector<96x16xf32> to vector<24x16xf32>
    %19 = arith.mulf %18, %9 : vector<24x16xf32>
    %20 = arith.addf %17, %19 : vector<24x16xf32>
    %21 = arith.mulf %16, %16 : vector<24x16xf32>
    %22 = vector.shape_cast %21 : vector<24x16xf32> to vector<8x3x16xf32>
    %cst_9 = arith.constant dense<0.000000e+00> : vector<8x16xf32>
    %23 = vector.multi_reduction <add>, %22, %cst_9 [1] : vector<8x3x16xf32> to vector<8x16xf32>
    %24 = math.sqrt %23 : vector<8x16xf32>
    %cst_10 = arith.constant 9.99999997E-7 : f32
    %25 = vector.broadcast %cst_10 : f32 to vector<8x16xf32>
    %26 = arith.addf %24, %25 : vector<8x16xf32>
    %c0_11 = arith.constant 0 : index
    %c0_12 = arith.constant 0 : index
    %c0_13 = arith.constant 0 : index
    %27 = vector.load %arg8[%c0_11, %c0_12, %c0_13] : memref<1x8x16xf32, #tpu.memory_space<vmem>>, vector<1x8x16xf32>
    %28 = vector.shape_cast %27 : vector<1x8x16xf32> to vector<8x16xf32>
    %29 = vector.shape_cast %26 : vector<8x16xf32> to vector<1x8x16xf32>
    tpu.vector_store %arg8[%c0_11, %c0_12, %c0_13], %29 {strides = array<i32>} : memref<1x8x16xf32, #tpu.memory_space<vmem>>, vector<1x8x16xf32>,
    %c0_14 = arith.constant 0 : index
    %c0_15 = arith.constant 0 : index
    %c0_16 = arith.constant 0 : index
    %30 = vector.load %arg6[%c0_14, %c0_15, %c0_16] : memref<1x24x16xf32, #tpu.memory_space<vmem>>, vector<1x24x16xf32>
    %31 = vector.shape_cast %30 : vector<1x24x16xf32> to vector<24x16xf32>
    %32 = vector.shape_cast %16 : vector<24x16xf32> to vector<1x24x16xf32>
    tpu.vector_store %arg6[%c0_14, %c0_15, %c0_16], %32 {strides = array<i32>} : memref<1x24x16xf32, #tpu.memory_space<vmem>>, vector<1x24x16xf32>,
    %c0_17 = arith.constant 0 : index
    %c0_18 = arith.constant 0 : index
    %c0_19 = arith.constant 0 : index
    %33 = vector.load %arg7[%c0_17, %c0_18, %c0_19] : memref<1x24x16xf32, #tpu.memory_space<vmem>>, vector<1x24x16xf32>
    %34 = vector.shape_cast %33 : vector<1x24x16xf32> to vector<24x16xf32>
    %35 = vector.shape_cast %20 : vector<24x16xf32> to vector<1x24x16xf32>
    tpu.vector_store %arg7[%c0_17, %c0_18, %c0_19], %35 {strides = array<i32>} : memref<1x24x16xf32, #tpu.memory_space<vmem>>, vector<1x24x16xf32>,
    return
  }
  func.func @transform_0(%arg0: i32, %arg1: i32) -> (i32, i32, i32) {
    %c0_i32 = arith.constant 0 : i32
    %c0_i32_0 = arith.constant 0 : i32
    return %arg0, %c0_i32, %arg1 : i32, i32, i32
  }
  func.func @transform_1(%arg0: i32, %arg1: i32) -> (i32, i32) {
    %c0_i32 = arith.constant 0 : i32
    %c0_i32_0 = arith.constant 0 : i32
    %c0_i32_1 = arith.constant 0 : i32
    return %c0_i32, %c0_i32_0 : i32, i32
  }
  func.func @transform_2(%arg0: i32, %arg1: i32) -> (i32, i32) {
    %c0_i32 = arith.constant 0 : i32
    %c0_i32_0 = arith.constant 0 : i32
    %c0_i32_1 = arith.constant 0 : i32
    return %c0_i32, %c0_i32_0 : i32, i32
  }
  func.func @transform_3(%arg0: i32, %arg1: i32) -> (i32, i32, i32) {
    %c0_i32 = arith.constant 0 : i32
    %c0_i32_0 = arith.constant 0 : i32
    return %arg0, %c0_i32, %arg1 : i32, i32, i32
  }
  func.func @transform_4(%arg0: i32, %arg1: i32) -> (i32, i32, i32) {
    %c0_i32 = arith.constant 0 : i32
    %c0_i32_0 = arith.constant 0 : i32
    return %arg0, %c0_i32, %arg1 : i32, i32, i32
  }
  func.func @transform_5(%arg0: i32, %arg1: i32) -> (i32, i32, i32) {
    %c0_i32 = arith.constant 0 : i32
    %c0_i32_0 = arith.constant 0 : i32
    return %arg0, %c0_i32, %arg1 : i32, i32, i32
  }
  func.func @transform_6(%arg0: i32, %arg1: i32) -> (i32, i32, i32) {
    %c0_i32 = arith.constant 0 : i32
    %c0_i32_0 = arith.constant 0 : i32
    return %arg0, %c0_i32, %arg1 : i32, i32, i32
  }
}

module attributes {stable_mosaic.version = 11 : i64} {
  func.func @_bn_leaky_kernel(%arg0: i32, %arg1: i32, %arg2: memref<1x24x16xf32, #tpu.memory_space<vmem>>, %arg3: memref<1x24x16xf32, #tpu.memory_space<vmem>>, %arg4: memref<1x8x16xf32, #tpu.memory_space<vmem>>, %arg5: memref<8x1xf32, #tpu.memory_space<vmem>>, %arg6: memref<8x1xf32, #tpu.memory_space<vmem>>, %arg7: memref<1x24x16xf32, #tpu.memory_space<vmem>>) attributes {dimension_semantics = [#tpu.dimension_semantics<parallel>, #tpu.dimension_semantics<parallel>], iteration_bounds = array<i64: 2, 1>, scalar_prefetch = 0 : i64, scratch_operands = 0 : i64, tpu.core_type = #tpu.core_type<tc>, window_params = [{transform_indices = @transform_0, window_bounds = array<i64: 1, 24, 16>}, {transform_indices = @transform_1, window_bounds = array<i64: 1, 24, 16>}, {transform_indices = @transform_2, window_bounds = array<i64: 1, 8, 16>}, {pipeline_mode = #tpu.pipeline_mode<synchronous>, transform_indices = @transform_3, window_bounds = array<i64: 8, 1>}, {pipeline_mode = #tpu.pipeline_mode<synchronous>, transform_indices = @transform_4, window_bounds = array<i64: 8, 1>}, {transform_indices = @transform_5, window_bounds = array<i64: 1, 24, 16>}]} {
    %c0 = arith.constant 0 : index
    %c0_0 = arith.constant 0 : index
    %c0_1 = arith.constant 0 : index
    %0 = vector.load %arg4[%c0, %c0_0, %c0_1] : memref<1x8x16xf32, #tpu.memory_space<vmem>>, vector<1x8x16xf32>
    %1 = vector.shape_cast %0 : vector<1x8x16xf32> to vector<8x16xf32>
    %c0_2 = arith.constant 0 : index
    %c0_3 = arith.constant 0 : index
    %2 = vector.load %arg5[%c0_2, %c0_3] : memref<8x1xf32, #tpu.memory_space<vmem>>, vector<8x1xf32>
    %3 = vector.broadcast %2 : vector<8x1xf32> to vector<8x16xf32>
    %4 = arith.subf %1, %3 : vector<8x16xf32>
    %c0_4 = arith.constant 0 : index
    %c0_5 = arith.constant 0 : index
    %5 = vector.load %arg6[%c0_4, %c0_5] : memref<8x1xf32, #tpu.memory_space<vmem>>, vector<8x1xf32>
    %6 = vector.broadcast %5 : vector<8x1xf32> to vector<8x16xf32>
    %7 = arith.mulf %4, %6 : vector<8x16xf32>
    %8 = arith.divf %7, %1 : vector<8x16xf32>
    %9 = vector.shape_cast %8 : vector<8x16xf32> to vector<8x1x16xf32>
    %10 = vector.shape_cast %9 : vector<8x1x16xf32> to vector<8x1x16xf32>
    %11 = vector.broadcast %10 : vector<8x1x16xf32> to vector<8x3x16xf32>
    %12 = vector.shape_cast %11 : vector<8x3x16xf32> to vector<24x16xf32>
    %c0_6 = arith.constant 0 : index
    %c0_7 = arith.constant 0 : index
    %c0_8 = arith.constant 0 : index
    %13 = vector.load %arg2[%c0_6, %c0_7, %c0_8] : memref<1x24x16xf32, #tpu.memory_space<vmem>>, vector<1x24x16xf32>
    %14 = vector.shape_cast %13 : vector<1x24x16xf32> to vector<24x16xf32>
    %15 = arith.mulf %14, %12 : vector<24x16xf32>
    %c0_9 = arith.constant 0 : index
    %c0_10 = arith.constant 0 : index
    %c0_11 = arith.constant 0 : index
    %16 = vector.load %arg3[%c0_9, %c0_10, %c0_11] : memref<1x24x16xf32, #tpu.memory_space<vmem>>, vector<1x24x16xf32>
    %17 = vector.shape_cast %16 : vector<1x24x16xf32> to vector<24x16xf32>
    %18 = arith.mulf %15, %17 : vector<24x16xf32>
    %19 = vector.shape_cast %18 : vector<24x16xf32> to vector<8x3x16xf32>
    %cst = arith.constant dense<0.000000e+00> : vector<8x16xf32>
    %20 = vector.multi_reduction <add>, %19, %cst [1] : vector<8x3x16xf32> to vector<8x16xf32>
    %21 = arith.mulf %17, %17 : vector<24x16xf32>
    %22 = vector.shape_cast %21 : vector<24x16xf32> to vector<8x3x16xf32>
    %cst_12 = arith.constant dense<0.000000e+00> : vector<8x16xf32>
    %23 = vector.multi_reduction <add>, %22, %cst_12 [1] : vector<8x3x16xf32> to vector<8x16xf32>
    %cst_13 = arith.constant 0.000000e+00 : f32
    %24 = vector.broadcast %cst_13 : f32 to vector<8x16xf32>
    %25 = arith.cmpf oge, %20, %24 : vector<8x16xf32>
    %cst_14 = arith.constant 9.99999997E-7 : f32
    %26 = vector.broadcast %cst_14 : f32 to vector<8x16xf32>
    %27 = arith.addf %23, %26 : vector<8x16xf32>
    %28 = arith.divf %20, %27 : vector<8x16xf32>
    %cst_15 = arith.constant 0.000000e+00 : f32
    %29 = vector.broadcast %cst_15 : f32 to vector<8x16xf32>
    %30 = arith.select %25, %29, %28 : vector<8x16xi1>, vector<8x16xf32>
    %cst_16 = arith.constant 8.000000e-01 : f32
    %31 = vector.broadcast %cst_16 : f32 to vector<8x16xf32>
    %32 = arith.mulf %30, %31 : vector<8x16xf32>
    %33 = vector.shape_cast %32 : vector<8x16xf32> to vector<8x1x16xf32>
    %34 = vector.shape_cast %33 : vector<8x1x16xf32> to vector<8x1x16xf32>
    %35 = vector.broadcast %34 : vector<8x1x16xf32> to vector<8x3x16xf32>
    %36 = vector.shape_cast %35 : vector<8x3x16xf32> to vector<24x16xf32>
    %37 = arith.mulf %36, %17 : vector<24x16xf32>
    %38 = arith.subf %15, %37 : vector<24x16xf32>
    %c0_17 = arith.constant 0 : index
    %c0_18 = arith.constant 0 : index
    %c0_19 = arith.constant 0 : index
    %39 = vector.load %arg7[%c0_17, %c0_18, %c0_19] : memref<1x24x16xf32, #tpu.memory_space<vmem>>, vector<1x24x16xf32>
    %40 = vector.shape_cast %39 : vector<1x24x16xf32> to vector<24x16xf32>
    %41 = vector.shape_cast %38 : vector<24x16xf32> to vector<1x24x16xf32>
    tpu.vector_store %arg7[%c0_17, %c0_18, %c0_19], %41 {strides = array<i32>} : memref<1x24x16xf32, #tpu.memory_space<vmem>>, vector<1x24x16xf32>,
    return
  }
  func.func @transform_0(%arg0: i32, %arg1: i32) -> (i32, i32, i32) {
    %c0_i32 = arith.constant 0 : i32
    %c0_i32_0 = arith.constant 0 : i32
    return %arg0, %c0_i32, %arg1 : i32, i32, i32
  }
  func.func @transform_1(%arg0: i32, %arg1: i32) -> (i32, i32, i32) {
    %c0_i32 = arith.constant 0 : i32
    %c0_i32_0 = arith.constant 0 : i32
    return %arg0, %c0_i32, %arg1 : i32, i32, i32
  }
  func.func @transform_2(%arg0: i32, %arg1: i32) -> (i32, i32, i32) {
    %c0_i32 = arith.constant 0 : i32
    %c0_i32_0 = arith.constant 0 : i32
    return %arg0, %c0_i32, %arg1 : i32, i32, i32
  }
  func.func @transform_3(%arg0: i32, %arg1: i32) -> (i32, i32) {
    %c0_i32 = arith.constant 0 : i32
    %c0_i32_0 = arith.constant 0 : i32
    %c0_i32_1 = arith.constant 0 : i32
    return %c0_i32, %c0_i32_0 : i32, i32
  }
  func.func @transform_4(%arg0: i32, %arg1: i32) -> (i32, i32) {
    %c0_i32 = arith.constant 0 : i32
    %c0_i32_0 = arith.constant 0 : i32
    %c0_i32_1 = arith.constant 0 : i32
    return %c0_i32, %c0_i32_0 : i32, i32
  }
  func.func @transform_5(%arg0: i32, %arg1: i32) -> (i32, i32, i32) {
    %c0_i32 = arith.constant 0 : i32
    %c0_i32_0 = arith.constant 0 : i32
    return %arg0, %c0_i32, %arg1 : i32, i32, i32
  }
}

</mosaic_0001>

<bundles_post_ra>
// kernel: vn_linear_leaky_relu_dual.2
= control target key start
LH: loop header
LB: loop body
LE: loop exit
PB: predicated region body
PF: predicated region fallthrough
CT: control target
= control target key end

     0   :  { %s1507_s21 = smov 0   ;;  %s1509_s22 = smov 0   ;;  %s1729_s0 = inlined_call_operand.vmem [shape: f32[2,12,16], index: 0, kind: input, shape index: {}]   ;;  %s1730_s1 = inlined_call_operand.vmem [shape: f32[96,12], index: 1, kind: input, shape index: {}]   ;;  %s1731_s2 = inlined_call_operand.vmem [shape: f32[24,1], index: 2, kind: input, shape index: {}]   ;;  %s1732_s3 = inlined_call_operand.vmem [shape: f32[2,3,16], index: 3, kind: input, shape index: {}]   ;;  %s1733_s4 = inlined_call_operand.vmem [shape: f32[2,24,16], index: 4, kind: output, shape index: {0}]   ;;  %s1734_s5 = inlined_call_operand.vmem [shape: f32[2,24,16], index: 5, kind: output, shape index: {1}]   ;;  %s1735_s6 = inlined_call_operand.vmem [shape: f32[2,8,16], index: 6, kind: output, shape index: {2}]  }
   0x1   :  { %s1511_s23 = smov 0  }
   0x2 LB: > { %s29_s24 = sadd.s32 1, %s1463_s22  ;;  %p1329_p0 = scmp.ge.s32.totalorder %s1467_s23, 1  ;;  %s1467_s23 = sphi %s1511_s23, %s17_s23   ;;  %s1463_s22 = sphi %s1509_s22, %s1737_s22   ;;  %s1459_s21 = sphi %s1507_s21, %s1736_s21  }
   0x3   : > { %p31_p1 = scmp.ge.s32.totalorder %s29_s24, 2  ;;  %p254_p2 = scmp.lt.s32.totalorder %s1467_s23, 3 }
   0x5   : > { %s1739_s24 = smov (%p31_p1, %s29_s24), 0  ;;  %p255_p3 = pnand %p1329_p0, %p254_p2 }
   0x6   : > { %p312_p4 = scmp.lt.s32.totalorder (!%p255_p3), %s1459_s21, 1  ;;  %v350_v0 = vld [vmem:[%s1730_s1] sm:$0xff] (!%p255_p3)  ;;  %vm364_vm0 = vcmask (!%p255_p3), 97280   ;;  %v356_v1 = vld [vmem:[%s1730_s1 + $0x30] sm:$0xff] (!%p255_p3)  ;;  %v1469_v2 = vmov (!%p255_p3), 0   ;;  %vm401_vm1 = vcmask (!%p255_p3), 1043456   ;;  %v543_v21 = vlaneseq (!%p255_p3) }
   0x7   : > { %258 = sbr.rel (%p255_p3) target bundleno = 314 (0x13a), region = 36  ;;  %1373 = vmatprep.mubr.msk.f32.mxu0 (!%p255_p3), %vm364_vm0, %v350_v0  ;;  %1427 = vset.pattern.permute.xlu0 (!%p255_p3), %v1469_v2  ;;  %v555_v3 = vld [vmem:[%s1731_s2] sm:$0xff] (!%p255_p3)  ;;  %v557_v4 = vld [vmem:[%s1731_s2 + $0x10] sm:$0xff] (!%p255_p3)  ;;  %vm1470_vm2 = vmmov (!%p255_p3), 1   ;;  %v556_v8 = vld [vmem:[%s1731_s2 + $0x8] sm:$0xff] (!%p255_p3)  ;;  %vm1131_vm4 = vcmask (!%p255_p3), 130048  }
   0x8   : > { %1428 = vset.pattern.permute.xlu1 (!%p255_p3), %v1469_v2  ;;  %1382 = vmatprep.mubr.msk.f32.mxu1 (!%p255_p3), %vm364_vm0, %v356_v1  ;;  %vm1392_vm3 = vmpackc.low (!%p255_p3), %vm401_vm1, %vm1470_vm2  ;;  %v351_v9 = vld [vmem:[%s1730_s1 + $0x8] sm:$0xff] (!%p255_p3)  ;;  %v357_v10 = vld [vmem:[%s1730_s1 + $0x38] sm:$0xff] (!%p255_p3)  ;;  %v1471_v19 = vmov (!%p255_p3), 1966171168   ;;  %v544_v23 = vshrl.u32 (!%p255_p3), %v543_v21, 7  ;;  %vm987_vm5 = vcmask (!%p255_p3), 124928  }
   0x9   : > { %560 = vperm.xlu0 (!%p255_p3), %1427, %v555_v3   ;;  %570 = vperm.xlu1 (!%p255_p3), %1428, %v557_v4   ;;  %v352_v11 = vld [vmem:[%s1730_s1 + $0x10] sm:$0xff] (!%p255_p3)  ;;  %v358_v12 = vld [vmem:[%s1730_s1 + $0x40] sm:$0xff] (!%p255_p3)  ;;  %v353_v13 = vld [vmem:[%s1730_s1 + $0x18] sm:$0xff] (!%p255_p3)  ;;  %v541_v20 = vunpack.c.l.s4 (!%p255_p3), %v1471_v19  ;;  %vm1116_vm10 = vcmask (!%p255_p3), 1041409   ;;  %vm1118_vm11 = vcmask (!%p255_p3), 1042434   ;;  %vm1120_vm12 = vcmask (!%p255_p3), 1043459  }
   0xa   : > { %v359_v14 = vld [vmem:[%s1730_s1 + $0x48] sm:$0xff] (!%p255_p3)  ;;  %v354_v15 = vld [vmem:[%s1730_s1 + $0x20] sm:$0xff] (!%p255_p3)  ;;  %v360_v16 = vld [vmem:[%s1730_s1 + $0x50] sm:$0xff] (!%p255_p3)  ;;  %vm1122_vm15 = vcmask (!%p255_p3), 1044484  }
   0xb   : > { %v355_v17 = vld [vmem:[%s1730_s1 + $0x28] sm:$0xff] (!%p255_p3)  ;;  %v361_v18 = vld [vmem:[%s1730_s1 + $0x58] sm:$0xff] (!%p255_p3)  ;;  %v542_v22 = vunpack.c.0.s8 (!%p255_p3), %v541_v20 }
   0xd   : > { %565 = vperm.xlu0 (!%p255_p3), %1427, %v556_v8   ;;  %v1592_v24 = vsub.s32 (!%p255_p3), %v542_v22, %v544_v23 }
   0xe   : > { %s1741_s21 = smov (!%p312_p4, %s1459_s21), 1 }
   0xf   : > { %s1354_s29 = sshll.u32 %s1741_s21, 4  ;;  %s1332_s15 = sshll.u32 %s1741_s21, 2 }
  0x10   : > { %s319_s10 = scalar_lea.vmem %s1729_s0, %s1354_s29  ;;  %s326_s18 = scalar_lea.vmem %s1732_s3, %s1332_s15 }
  0x11   : > { %v362_v5 = vld [vmem:[%s319_s10] sm:$0xff]  ;;  %v363_v6 = vld [vmem:[%s319_s10 + $0x8] sm:$0xf]  ;;  %s1399_s19 = smul.u32 24, %s1741_s21  ;;  %s1335_s30 = sshll.u32 %s1741_s21, 3 }
  0x12   : > { %v1391_v7 = vpack.c.bf16 %v363_v6, %v362_v5  ;;  %v1349_v25 = vld.sshfl [vmem:[%s326_s18] sm:$0x13 pattern:$0x75316420]  ;;  %s349_s9 = scalar_lea.vmem %s1735_s6, %s1335_s30 }
  0x13   : > { %v539_v26 = vcombine.high %v1349_v25, %v1349_v25  ;;  %v546_v27 = vrot.slane %v1349_v25, %v1592_v24  ;;  %s342_s26 = scalar_lea.vmem %s1734_s5, %s1399_s19  ;;  %s1609_s29 = scalar_lea.vmem %s1733_s4, %s1399_s19 }
  0x14   : > { %1393 = vmatprep.subr.msk.bf16.mxu0 %vm1392_vm3, %v1391_v7  ;;  %1397 = vmatprep.subr.msk.bf16.mxu1 %vm1392_vm3, %v1391_v7 }
  0x15   : > { %1396 = vmatpush3.bf16.msk.msra.mxu0 %vm1392_vm3, %v1391_v7  ;;  %1398 = vmatpush3.bf16.msk.msra.mxu1 %vm1392_vm3, %v1391_v7  ;;  %v553_v28 = vrot.slane %v539_v26, %v1592_v24  ;;  %v554_v29 = vcombine.high %v546_v27, %v546_v27 }
  0x17   : > { %v576_v30 = vcombine.low %v546_v27, %v553_v28  ;;  %v577_v31 = vcombine.low %v554_v29, %v546_v27  ;;  %v578_v32 = vcombine.low %v553_v28, %v554_v29 }
  0x18   : > { %1374 = vmatmul.mubr.msk.f32.vlgmr.msra.gmra.mrb[0].mxu0 %vm364_vm0, %v351_v9  ;;  %1383 = vmatmul.mubr.msk.f32.vlgmr.msra.gmra.mrb[0].mxu1 %vm364_vm0, %v357_v10 }
  0x19   : > { %1376 = vmatprep.mubr.msk.f32.mxu0 %vm364_vm0, %v352_v11  ;;  %1385 = vmatprep.mubr.msk.f32.mxu1 %vm364_vm0, %v358_v12  ;;  %v585_v33 = vrot.slane %v576_v30, %v1592_v24  ;;  %v592_v34 = vrot.slane %v577_v31, %v1592_v24  ;;  %v599_v35 = vrot.slane %v578_v32, %v1592_v24 }
  0x1b   : > { %v600_v36 = vcombine.low %v585_v33, %v592_v34  ;;  %v601_v37 = vcombine.low %v599_v35, %v585_v33  ;;  %v617_v41 = vcombine.low %v592_v34, %v599_v35 }
  0x1c   : > { %1377 = vmatmul.mubr.msk.f32.gmra.mrb[2].mxu0 %vm364_vm0, %v353_v13  ;;  %1386 = vmatmul.mubr.msk.f32.gmra.mrb[2].mxu1 %vm364_vm0, %v359_v14 }
  0x1d   : > { %1379 = vmatprep.mubr.msk.f32.mxu0 %vm364_vm0, %v354_v15  ;;  %1388 = vmatprep.mubr.msk.f32.mxu1 %vm364_vm0, %v360_v16  ;;  %v608_v39 = vrot.slane %v600_v36, %v1592_v24  ;;  %v615_v40 = vrot.slane %v601_v37, %v1592_v24  ;;  %v624_v47 = vrot.slane %v617_v41, %v1592_v24 }
  0x1f   : > { %v616_v46 = vcombine.low %v608_v39, %v615_v40  ;;  %v626_v57 = vcombine.low %v615_v40, %v624_v47  ;;  %v625_v60 = vcombine.low %v624_v47, %v608_v39 }
  0x20   : > { %1380 = vmatmul.mubr.msk.f32.gmra.mrb[4].mxu0 %vm364_vm0, %v355_v17  ;;  %1389 = vmatmul.mubr.msk.f32.gmra.mrb[4].mxu1 %vm364_vm0, %v361_v18 }
  0x88   : > { %v561_v38 = vpop.permute.xlu0 %560  ;;  %v571_v54 = vpop.permute.xlu1 %570 }
  0x8c   : > { %v566_v56 = vpop.permute.xlu0 %565 }
  0xeb   : > { %v1375_v42 = vpop.f32.mrb[0].mxu0  ;;  %v1384_v43 = vpop.f32.mrb[0].mxu1 }
  0xec   : > { %v471_v44 = vpop.f32.mrb[1].mxu0  ;;  %v501_v45 = vpop.f32.mrb[1].mxu1 }
  0xef   : > { %v1378_v48 = vpop.f32.mrb[2].mxu0  ;;  %v1387_v49 = vpop.f32.mrb[2].mxu1 }
  0xf0   : > { %v573_v50 = vadd.f32 %v1378_v48, %v561_v38  ;;  %v481_v51 = vpop.f32.mrb[3].mxu0  ;;  %v636_v52 = vmul.f32 %v1387_v49, %v616_v46  ;;  %v511_v53 = vpop.f32.mrb[3].mxu1 }
  0xf2   : > { %v630_v55 = vmul.f32 %v616_v46, %v573_v50  ;;  %v639_v58 = vadd.f32 %v636_v52, %v501_v45 }
  0xf3   : > { %v1381_v59 = vpop.f32.mrb[4].mxu0  ;;  %v1390_v61 = vpop.f32.mrb[4].mxu1 }
  0xf4   : > { %v633_v62 = vadd.f32 %v630_v55, %v471_v44  ;;  %v575_v63 = vadd.f32 %v1381_v59, %v571_v54  ;;  %v491_v0 = vpop.f32.mrb[5].mxu0  ;;  %1136 = vst.msk [vmem:[%s342_s26] sm:$0xff] %vm1131_vm4, %v639_v58  ;;  %v638_v1 = vmul.f32 %v1390_v61, %v626_v57  ;;  %v521_v2 = vpop.f32.mrb[5].mxu1 }
  0xf5   : > { %v574_v3 = vadd.f32 %v566_v56, %v491_v0  ;;  %v637_v4 = vmul.f32 %v625_v60, %v521_v2 }
  0xf6   : > { %v642_v5 = vmul.f32 %v633_v62, %v633_v62  ;;  %1133 = vst.msk [vmem:[%s1609_s29] sm:$0xff] %vm1131_vm4, %v633_v62  ;;  %v632_v6 = vmul.f32 %v626_v57, %v575_v63  ;;  %v641_v7 = vadd.f32 %v638_v1, %v511_v53 }
  0xf7   : > { %v631_v8 = vmul.f32 %v625_v60, %v574_v3  ;;  %v640_v9 = vadd.f32 %v1384_v43, %v637_v4 }
  0xf8   : > { %v648_v10 = vcombine.high %v642_v5, %v642_v5  ;;  %v655_v11 = vrot.slane %v642_v5, %v1592_v24  ;;  %v635_v12 = vadd.f32 %v632_v6, %v481_v51  ;;  %1138 = vst.msk [vmem:[%s342_s26 + $0x10] sm:$0xff] %vm1131_vm4, %v641_v7 }
  0xf9   : > { %v634_v13 = vadd.f32 %v1375_v42, %v631_v8  ;;  %1137 = vst.msk [vmem:[%s342_s26 + $0x8] sm:$0xff] %vm1131_vm4, %v640_v9 }
  0xfa   : > { %v662_v14 = vrot.slane %v648_v10, %v1592_v24  ;;  %v663_v15 = vcombine.high %v655_v11, %v655_v11  ;;  %v671_v16 = vrot.slane %v655_v11, %v1592_v24  ;;  %v644_v17 = vmul.f32 %v635_v12, %v635_v12  ;;  %1135 = vst.msk [vmem:[%s1609_s29 + $0x10] sm:$0xff] %vm1131_vm4, %v635_v12 }
  0xfb   : > { %v643_v18 = vmul.f32 %v634_v13, %v634_v13  ;;  %1134 = vst.msk [vmem:[%s1609_s29 + $0x8] sm:$0xff] %vm1131_vm4, %v634_v13 }
  0xfc   : > { %v664_v19 = vcombine.high %v662_v14, %v662_v14  ;;  %v685_v20 = vrot.slane %v663_v15, %v1592_v24  ;;  %v693_v21 = vcombine.high %v671_v16, %v671_v16  ;;  %v746_v22 = vcombine.high %v644_v17, %v644_v17 }
  0xfd   : > { %v753_v23 = vrot.slane %v644_v17, %v1592_v24  ;;  %v697_v25 = vcombine.high %v643_v18, %v643_v18  ;;  %v704_v26 = vrot.slane %v643_v18, %v1592_v24  ;;  %v678_v27 = vrot.slane %v662_v14, %v1592_v24 }
  0xfe   : > { %v692_v28 = vrot.slane %v664_v19, %v1592_v24  ;;  %v695_v29 = vcombine.high %v685_v20, %v685_v20  ;;  %v795_v30 = vcombine.low %v671_v16, %v685_v20  ;;  %v809_v31 = vrot.slane %v693_v21, %v1592_v24 }
  0xff   : > { %v760_v32 = vrot.slane %v746_v22, %v1592_v24  ;;  %v761_v33 = vcombine.high %v753_v23, %v753_v23  ;;  %v711_v34 = vrot.slane %v697_v25, %v1592_v24  ;;  %v769_v38 = vrot.slane %v753_v23, %v1592_v24 }
 0x100   : > { %v802_v35 = vrot.slane %v795_v30, %v1592_v24  ;;  %v818_v36 = vcombine.low %v695_v29, %v678_v27  ;;  %v832_v37 = vrot.slane %v692_v28, %v1592_v24  ;;  %v712_v42 = vcombine.high %v704_v26, %v704_v26 }
 0x101   : > { %v762_v39 = vcombine.high %v760_v32, %v760_v32  ;;  %v776_v40 = vrot.slane %v760_v32, %v1592_v24  ;;  %v1636_v41 = vrot.slane %v761_v33, %v1592_v24  ;;  %v713_v45 = vcombine.high %v711_v34, %v711_v34 }
 0x102   : > { %v810_v43 = vcombine.low %v802_v35, %v809_v31  ;;  %v825_v44 = vrot.slane %v818_v36, %v1592_v24  ;;  %v720_v46 = vrot.slane %v704_v26, %v1592_v24  ;;  %v1350_v47 = vcombine.high %v678_v27, %v692_v28 }
 0x103   : > { %v790_v48 = vrot.slane %v762_v39, %v1592_v24  ;;  %v792_v49 = vcombine.high %v776_v40, %v776_v40  ;;  %v1351_v50 = vcombine.high %v769_v38, %v1636_v41  ;;  %v947_v53 = vrot.slane %v776_v40, %v1592_v24 }
 0x104   : > { %v817_v51 = vrot.slane %v810_v43, %v1592_v24  ;;  %v833_v52 = vcombine.low %v825_v44, %v832_v37  ;;  %v727_v54 = vrot.slane %v711_v34, %v1592_v24  ;;  %v734_v58 = vrot.slane %v712_v42, %v1592_v24 }
 0x105   : > { %v794_v55 = vcombine.high %v790_v48, %v790_v48  ;;  %v940_v56 = vrot.slane %v1351_v50, %v1592_v24  ;;  %v956_v57 = vcombine.low %v790_v48, %v792_v49  ;;  %v741_v61 = vrot.slane %v713_v45, %v1592_v24 }
 0x106   : > { %v840_v59 = vrot.slane %v833_v52, %v1592_v24  ;;  %v988_v60 = vsel %vm987_vm5, %v817_v51, 0.0  ;;  %v742_v62 = vcombine.high %v720_v46, %v720_v46  ;;  %v743_v4 = vcombine.high %v727_v54, %v727_v54 }
 0x107   : > { %v989_v63 = vrot.slane %v988_v60, 4  ;;  %v948_v0 = vcombine.low %v940_v56, %v947_v53  ;;  %v963_v1 = vrot.slane %v956_v57, %v1592_v24  ;;  %v970_v2 = vrot.slane %v794_v55, %v1592_v24 }
 0x108   : > { %v995_v3 = vsel %vm987_vm5, %v840_v59, 0.0  ;;  %v744_v5 = vcombine.high %v734_v58, %v734_v58  ;;  %v745_v6 = vcombine.high %v741_v61, %v741_v61  ;;  %v848_v11 = vrot.slane %v1350_v47, %v1592_v24 }
 0x109   : > { %v990_v7 = vadd.f32 %v989_v63, %v988_v60  ;;  %v996_v8 = vrot.slane %v995_v3, 4  ;;  %v955_v9 = vrot.slane %v948_v0, %v1592_v24  ;;  %v971_v10 = vcombine.low %v963_v1, %v970_v2 }
 0x10a   : > { %v855_v12 = vrot.slane %v720_v46, %v1592_v24  ;;  %v864_v13 = vcombine.low %v734_v58, %v742_v62  ;;  %v878_v14 = vrot.slane %v744_v5, %v1592_v24  ;;  %v887_v22 = vcombine.low %v727_v54, %v741_v61 }
 0x10b   : > { %v991_v15 = vrot.slane %v990_v7, 2  ;;  %v997_v16 = vadd.f32 %v996_v8, %v995_v3  ;;  %v978_v17 = vrot.slane %v971_v10, %v1592_v24  ;;  %v1030_v18 = vsel %vm987_vm5, %v955_v9, 0.0 }
 0x10c   : > { %v1031_v19 = vrot.slane %v1030_v18, 4  ;;  %v856_v20 = vcombine.low %v848_v11, %v855_v12  ;;  %v871_v21 = vrot.slane %v864_v13, %v1592_v24  ;;  %v901_v27 = vrot.slane %v743_v4, %v1592_v24 }
 0x10d   : > { %v992_v23 = vadd.f32 %v991_v15, %v990_v7  ;;  %v998_v25 = vrot.slane %v997_v16, 2  ;;  %v1037_v26 = vsel %vm987_vm5, %v978_v17, 0.0  ;;  %v894_v34 = vrot.slane %v887_v22, %v1592_v24 }
 0x10e   : > { %v1032_v28 = vadd.f32 %v1031_v19, %v1030_v18  ;;  %v1038_v29 = vrot.slane %v1037_v26, 4  ;;  %v863_v30 = vrot.slane %v856_v20, %v1592_v24  ;;  %v879_v31 = vcombine.low %v871_v21, %v878_v14 }
 0x10f   : > { %v993_v32 = vrot.slane %v992_v23, 1  ;;  %v999_v33 = vadd.f32 %v998_v25, %v997_v16  ;;  %v910_v35 = vcombine.low %v745_v6, %v769_v38  ;;  %v902_v43 = vcombine.low %v894_v34, %v901_v27 }
 0x110   : > { %v1039_v36 = vadd.f32 %v1038_v29, %v1037_v26  ;;  %v886_v37 = vrot.slane %v879_v31, %v1592_v24  ;;  %v1002_v39 = vsel %vm987_vm5, %v863_v30, 0.0  ;;  %v1033_v42 = vrot.slane %v1032_v28, 2 }
 0x111   : > { %v1000_v40 = vrot.slane %v999_v33, 1  ;;  %v1666_v44 = vadd.f32 %v993_v32, %v992_v23  ;;  %v917_v46 = vrot.slane %v910_v35, %v1592_v24  ;;  %v1003_v47 = vrot.slane %v1002_v39, 4 }
 0x112   : > { %v1040_v45 = vrot.slane %v1039_v36, 2  ;;  %v924_v49 = vrot.slane %v1636_v41, %v1592_v24  ;;  %v909_v38 = vrot.slane %v902_v43, %v1592_v24  ;;  %v1009_v50 = vsel %vm987_vm5, %v886_v37, 0.0 }
 0x113   : > { %v1001_v48 = vadd.f32 %v1000_v40, %v999_v33  ;;  %v1034_v51 = vadd.f32 %v1033_v42, %v1032_v28  ;;  %v1004_v54 = vadd.f32 %v1003_v47, %v1002_v39  ;;  %v1010_v55 = vrot.slane %v1009_v50, 4 }
 0x114   : > { %v1041_v52 = vadd.f32 %v1040_v45, %v1039_v36  ;;  %v925_v53 = vcombine.low %v917_v46, %v924_v49  ;;  %v1016_v56 = vsel %vm987_vm5, %v909_v38, 0.0  ;;  %vm1046_vm7 = vcmp.eq.f32.partialorder %v1666_v44, inf }
 0x115   : > { %1429 = vrsqrt.f32 %v1001_v48  ;;  %v1005_v58 = vrot.slane %v1004_v54, 2  ;;  %v1011_v59 = vadd.f32 %v1010_v55, %v1009_v50  ;;  %v1035_v60 = vrot.slane %v1034_v51, 1 }
 0x116   : > { %1431 = vrsqrt.f32 %v1666_v44  ;;  %v932_v57 = vrot.slane %v925_v53, %v1592_v24  ;;  %v1042_v41 = vrot.slane %v1041_v52, 1  ;;  %v1017_v63 = vrot.slane %v1016_v56, 4 }
 0x117   : > { %v1006_v61 = vadd.f32 %v1005_v58, %v1004_v54  ;;  %v1012_v62 = vrot.slane %v1011_v59, 2  ;;  %v1677_v5 = vadd.f32 %v1035_v60, %v1034_v51  ;;  %vm1053_vm6 = vcmp.eq.f32.partialorder %v1001_v48, inf }
 0x118   : > { %v1023_v0 = vsel %vm987_vm5, %v932_v57, 0.0  ;;  %v1018_v4 = vadd.f32 %v1017_v63, %v1016_v56  ;;  %v1679_v8 = vadd.f32 %v1042_v41, %v1041_v52  ;;  %v1056_v22 = vand.u32 2147483648, %v1001_v48 }
 0x119   : > { %v1024_v1 = vrot.slane %v1023_v0, 4  ;;  %v1007_v2 = vrot.slane %v1006_v61, 1  ;;  %v1013_v3 = vadd.f32 %v1012_v62, %v1011_v59  ;;  %vm1055_vm8 = vcmp.eq.f32.partialorder %v1001_v48, 0.0 }
 0x11a   : > { %v1019_v10 = vrot.slane %v1018_v4, 2  ;;  %v1049_v26 = vand.u32 2147483648, %v1666_v44  ;;  %vm1048_vm9 = vcmp.eq.f32.partialorder %v1666_v44, 0.0  ;;  %vm1088_vm13 = vcmp.eq.f32.partialorder %v1677_v5, inf }
 0x11b   : > { %v1025_v6 = vadd.f32 %v1024_v1, %v1023_v0  ;;  %v1008_v24 = vadd.f32 %v1007_v2, %v1006_v61  ;;  %v1014_v9 = vrot.slane %v1013_v3, 1  ;;  %vm1090_vm0 = vcmp.eq.f32.partialorder %v1677_v5, 0.0 }
 0x11c   : > { %v1020_v15 = vadd.f32 %v1019_v10, %v1018_v4  ;;  %v1091_v37 = vand.u32 2147483648, %v1677_v5  ;;  %vm1095_vm3 = vcmp.eq.f32.partialorder %v1679_v8, inf  ;;  %vm1097_vm5 = vcmp.eq.f32.partialorder %v1679_v8, 0.0 }
 0x11d   : > { %v1026_v12 = vrot.slane %v1025_v6, 2  ;;  %v1015_v14 = vadd.f32 %v1014_v9, %v1013_v3  ;;  %1433 = vrsqrt.f32 %v1008_v24  ;;  %vm1060_vm14 = vcmp.eq.f32.partialorder %v1008_v24, inf }
 0x11e   : > { %1435 = vrsqrt.f32 %v1677_v5  ;;  %v1021_v18 = vrot.slane %v1020_v15, 1  ;;  %v1063_v35 = vand.u32 2147483648, %v1008_v24  ;;  %vm1062_vm1 = vcmp.eq.f32.partialorder %v1008_v24, 0.0 }
 0x11f   : > { %v1430_v7 = vpop.eup %1429  ;;  %v1027_v16 = vadd.f32 %v1026_v12, %v1025_v6  ;;  %1437 = vrsqrt.f32 %v1679_v8  ;;  %vm1067_vm2 = vcmp.eq.f32.partialorder %v1015_v14, inf  ;;  %v1070_v46 = vand.u32 2147483648, %v1015_v14 }
 0x120   : > { %v1432_v11 = vpop.eup %1431  ;;  %v1052_v13 = vmul.f32 %v1430_v7, %v1001_v48  ;;  %1439 = vrsqrt.f32 %v1015_v14  ;;  %v1022_v21 = vadd.f32 %v1021_v18, %v1020_v15  ;;  %v1098_v38 = vand.u32 2147483648, %v1679_v8 }
 0x121   : > { %v1045_v17 = vmul.f32 %v1432_v11, %v1666_v44  ;;  %v1028_v19 = vrot.slane %v1027_v16, 1 }
 0x122   : > { %v1054_v20 = vsel %vm1053_vm6, %v1001_v48, %v1052_v13  ;;  %1441 = vrsqrt.f32 %v1022_v21  ;;  %vm1069_vm6 = vcmp.eq.f32.partialorder %v1015_v14, 0.0  ;;  %v1077_v55 = vand.u32 2147483648, %v1022_v21 }
 0x123   : > { %v1685_v23 = vadd.f32 %v1028_v19, %v1027_v16  ;;  %v1047_v25 = vsel %vm1046_vm7, %v1666_v44, %v1045_v17  ;;  %v1057_v27 = vsel %vm1055_vm8, %v1056_v22, %v1054_v20  ;;  %vm1074_vm7 = vcmp.eq.f32.partialorder %v1022_v21, inf }
 0x124   : > { %v1050_v28 = vsel %vm1048_vm9, %v1049_v26, %v1047_v25  ;;  %v1101_v30 = vadd.f32 1e-06, %v1057_v27  ;;  %vm1076_vm8 = vcmp.eq.f32.partialorder %v1022_v21, 0.0 }
 0x125   : > { %1443 = vrsqrt.f32 %v1685_v23  ;;  %v1100_v34 = vadd.f32 1e-06, %v1050_v28  ;;  %vm1081_vm9 = vcmp.eq.f32.partialorder %v1685_v23, inf  ;;  %v1084_v41 = vand.u32 2147483648, %v1685_v23 }
 0x127   : > { %v1434_v29 = vpop.eup %1433  ;;  %v1117_v40 = vsel %vm1116_vm10, %v1101_v30, %v1100_v34  ;;  %vm1083_vm10 = vcmp.eq.f32.partialorder %v1685_v23, 0.0 }
 0x128   : > { %v1436_v31 = vpop.eup %1435  ;;  %v1059_v32 = vmul.f32 %v1434_v29, %v1008_v24 }
 0x129   : > { %v1438_v33 = vpop.eup %1437  ;;  %v1087_v42 = vmul.f32 %v1436_v31, %v1677_v5 }
 0x12a   : > { %v1440_v36 = vpop.eup %1439  ;;  %v1061_v39 = vsel %vm1060_vm14, %v1008_v24, %v1059_v32  ;;  %v1094_v45 = vmul.f32 %v1438_v33, %v1679_v8 }
 0x12b   : > { %v1064_v43 = vsel %vm1062_vm1, %v1063_v35, %v1061_v39  ;;  %v1066_v44 = vmul.f32 %v1440_v36, %v1015_v14  ;;  %v1089_v54 = vsel %vm1088_vm13, %v1677_v5, %v1087_v42  ;;  %vm1126_vm13 = vcmask 1046534  }
 0x12c   : > { %v1102_v47 = vadd.f32 1e-06, %v1064_v43  ;;  %v1442_v48 = vpop.eup %1441  ;;  %v1096_v57 = vsel %vm1095_vm3, %v1679_v8, %v1094_v45  ;;  %v1092_v62 = vsel %vm1090_vm0, %v1091_v37, %v1089_v54 }
 0x12d   : > { %v1068_v49 = vsel %vm1067_vm2, %v1015_v14, %v1066_v44  ;;  %v1073_v51 = vmul.f32 %v1442_v48, %v1022_v21  ;;  %v1099_v1 = vsel %vm1097_vm5, %v1098_v38, %v1096_v57  ;;  %v1106_v6 = vadd.f32 1e-06, %v1092_v62 }
 0x12e   : > { %v1071_v50 = vsel %vm1069_vm6, %v1070_v46, %v1068_v49  ;;  %v1119_v52 = vsel %vm1118_vm11, %v1102_v47, %v1117_v40  ;;  %vm1124_vm11 = vcmask 1045509   ;;  %v1107_v5 = vadd.f32 1e-06, %v1099_v1 }
 0x12f   : > { %v1444_v53 = vpop.eup %1443  ;;  %v1103_v56 = vadd.f32 1e-06, %v1071_v50  ;;  %v1075_v58 = vsel %vm1074_vm7, %v1022_v21, %v1073_v51 }
 0x130   : > { %v1080_v59 = vmul.f32 %v1444_v53, %v1685_v23  ;;  %v1078_v60 = vsel %vm1076_vm8, %v1077_v55, %v1075_v58 }
 0x131   : > { %v1121_v61 = vsel %vm1120_vm12, %v1103_v56, %v1119_v52  ;;  %v1104_v0 = vadd.f32 1e-06, %v1078_v60  ;;  %vm1128_vm12 = vcmask 1047559  }
 0x132   : > { %v1082_v63 = vsel %vm1081_vm9, %v1685_v23, %v1080_v59 }
 0x133   : > { %v1085_v2 = vsel %vm1083_vm10, %v1084_v41, %v1082_v63  ;;  %v1123_v4 = vsel %vm1122_vm15, %v1104_v0, %v1121_v61 }
 0x134   : > { %v1105_v3 = vadd.f32 1e-06, %v1085_v2 }
 0x136   : > { %v1125_v7 = vsel %vm1124_vm11, %v1105_v3, %v1123_v4 }
 0x137   : > { %v1127_v24 = vsel %vm1126_vm13, %v1106_v6, %v1125_v7 }
 0x138   : > { %v1129_v9 = vsel %vm1128_vm12, %v1107_v5, %v1127_v24 }
 0x139   : > { %1132 = vst.msk [vmem:[%s349_s9] sm:$0xff] %vm1131_vm4, %v1129_v9 }
 0x13a PF: > { %s17_s23 = sadd.s32 1, %s1467_s23   ;;  %s1736_s21 = smov %s1463_s22 }
 0x13b   : > { %p14_p5 = scmp.ge.s32.totalorder %s17_s23, 4   ;;  %s1737_s22 = smov %s1739_s24 }
 0x13d   :  { %16 = sbr.rel (!%p14_p5) target bundleno = 2 (0x2), region = 93 }

// kernel: vn_linear_leaky_relu_dual.3
= control target key start
LH: loop header
LB: loop body
LE: loop exit
PB: predicated region body
PF: predicated region fallthrough
CT: control target
= control target key end

     0   :  { %s2439_s18 = smov 0   ;;  %s2441_s19 = smov 0   ;;  %s2890_s0 = inlined_call_operand.vmem [shape: f32[2,24,16], index: 0, kind: input, shape index: {}]   ;;  %s2891_s1 = inlined_call_operand.vmem [shape: f32[2,24,16], index: 1, kind: input, shape index: {}]   ;;  %s2892_s2 = inlined_call_operand.vmem [shape: f32[2,8,16], index: 2, kind: input, shape index: {}]   ;;  %s2893_s3 = inlined_call_operand.vmem [shape: f32[8,1], index: 3, kind: input, shape index: {}]   ;;  %s2894_s4 = inlined_call_operand.vmem [shape: f32[8,1], index: 4, kind: input, shape index: {}]   ;;  %s2895_s5 = inlined_call_operand.vmem [shape: f32[2,24,16], index: 5, kind: output, shape index: {}]  }
   0x1   :  { %s2443_s20 = smov 0  }
   0x2 LB: > { %s27_s21 = sadd.s32 1, %s2401_s19  ;;  %p2323_p0 = scmp.ge.s32.totalorder %s2405_s20, 1  ;;  %s2405_s20 = sphi %s2443_s20, %s15_s20   ;;  %s2401_s19 = sphi %s2441_s19, %s2900_s19   ;;  %s2397_s18 = sphi %s2439_s18, %s2899_s18  }
   0x3   : > { %p29_p1 = scmp.ge.s32.totalorder %s27_s21, 2  ;;  %p235_p2 = scmp.lt.s32.totalorder %s2405_s20, 3 }
   0x5   : > { %s2902_s21 = smov (%p29_p1, %s27_s21), 0  ;;  %p236_p3 = pnand %p2323_p0, %p235_p2 }
   0x6   : > { %v316_v0 = vld [vmem:[%s2893_s3] sm:$0xff] (!%p236_p3)  ;;  %v2407_v1 = vmov (!%p236_p3), 0   ;;  %p284_p4 = scmp.lt.s32.totalorder (!%p236_p3), %s2397_s18, 1  ;;  %v2408_v3 = vmov (!%p236_p3), 1966171168   ;;  %v337_v5 = vlaneseq (!%p236_p3)  ;;  %vm1102_vm0 = vcmask (!%p236_p3), 124928  }
   0x7   : > { %239 = sbr.rel (%p236_p3) target bundleno = 254 (0xfe), region = 40  ;;  %2361 = vset.pattern.permute.xlu0 (!%p236_p3), %v2407_v1  ;;  %v323_v2 = vld [vmem:[%s2894_s4] sm:$0xff] (!%p236_p3)  ;;  %v335_v4 = vunpack.c.l.s4 (!%p236_p3), %v2408_v3  ;;  %vm2199_vm9 = vcmask (!%p236_p3), 130048  }
   0x8   : > { %319 = vperm.xlu0 (!%p236_p3), %2361, %v316_v0   ;;  %v2476_v9 = vshrl.u32 (!%p236_p3), %v337_v5, 7 }
   0x9   : > { %v336_v8 = vunpack.c.0.s8 (!%p236_p3), %v335_v4 }
   0xb   : > { %v2483_v12 = vsub.s32 (!%p236_p3), %v336_v8, %v2476_v9 }
   0xc   : > { %326 = vperm.xlu0 (!%p236_p3), %2361, %v323_v2  }
   0xe   : > { %s2904_s18 = smov (!%p284_p4, %s2397_s18), 1 }
   0xf   : > { %s2466_s26 = smul.u32 24, %s2904_s18  ;;  %s2326_s30 = sshll.u32 %s2904_s18, 3 }
  0x10   : > { %s306_s8 = scalar_lea.vmem %s2892_s2, %s2326_s30 }
  0x11   : > { %s299_s29 = scalar_lea.vmem %s2891_s1, %s2466_s26  ;;  %s2645_s11 = scalar_lea.vmem %s2890_s0, %s2466_s26 }
  0x12   : > { %v2472_v6 = vld [vmem:[%s299_s29] sm:$0xff]  ;;  %v2474_v7 = vld [vmem:[%s299_s29 + $0x8] sm:$0xff]  ;;  %v2485_v13 = vld [vmem:[%s299_s29 + $0x10] sm:$0xff]  ;;  %s314_s14 = scalar_lea.vmem %s2895_s5, %s2466_s26 }
  0x13   : > { %v1159_v10 = vmul.f32 %v2472_v6, %v2472_v6  ;;  %v1160_v11 = vmul.f32 %v2474_v7, %v2474_v7  ;;  %v1161_v17 = vmul.f32 %v2485_v13, %v2485_v13 }
  0x15   : > { %v1172_v14 = vrot.slane %v1159_v10, %v2483_v12  ;;  %v1214_v15 = vcombine.high %v1160_v11, %v1160_v11  ;;  %v1165_v16 = vcombine.high %v1159_v10, %v1159_v10  ;;  %v1221_v21 = vrot.slane %v1160_v11, %v2483_v12 }
  0x16   : > { %v1263_v22 = vcombine.high %v1161_v17, %v1161_v17  ;;  %v1270_v29 = vrot.slane %v1161_v17, %v2483_v12 }
  0x17   : > { %v1180_v18 = vcombine.high %v1172_v14, %v1172_v14  ;;  %v1228_v19 = vrot.slane %v1214_v15, %v2483_v12  ;;  %v1179_v20 = vrot.slane %v1165_v16, %v2483_v12  ;;  %v1229_v26 = vcombine.high %v1221_v21, %v1221_v21 }
  0x18   : > { %v1188_v27 = vrot.slane %v1172_v14, %v2483_v12  ;;  %v1237_v28 = vrot.slane %v1221_v21, %v2483_v12  ;;  %v1277_v30 = vrot.slane %v1263_v22, %v2483_v12  ;;  %v1278_v38 = vcombine.high %v1270_v29, %v1270_v29 }
  0x19   : > { %v1202_v23 = vrot.slane %v1180_v18, %v2483_v12  ;;  %v1230_v24 = vcombine.high %v1228_v19, %v1228_v19  ;;  %v1181_v25 = vcombine.high %v1179_v20, %v1179_v20  ;;  %v1195_v31 = vrot.slane %v1179_v20, %v2483_v12 }
  0x1a   : > { %v1251_v35 = vrot.slane %v1229_v26, %v2483_v12  ;;  %v1210_v36 = vcombine.high %v1188_v27, %v1188_v27  ;;  %v1259_v37 = vcombine.high %v1237_v28, %v1237_v28  ;;  %v1244_v40 = vrot.slane %v1228_v19, %v2483_v12 }
  0x1b   : > { %v1212_v32 = vcombine.high %v1202_v23, %v1202_v23  ;;  %v1258_v33 = vrot.slane %v1230_v24, %v2483_v12  ;;  %v1209_v34 = vrot.slane %v1181_v25, %v2483_v12  ;;  %v1312_v39 = vcombine.low %v1188_v27, %v1202_v23 }
  0x1c   : > { %v1279_v41 = vcombine.high %v1277_v30, %v1277_v30  ;;  %v1293_v42 = vrot.slane %v1277_v30, %v2483_v12  ;;  %v1261_v45 = vcombine.high %v1251_v35, %v1251_v35  ;;  %v1286_v46 = vrot.slane %v1270_v29, %v2483_v12 }
  0x1d   : > { %v1262_v43 = vcombine.high %v1258_v33, %v1258_v33  ;;  %v1335_v44 = vcombine.low %v1212_v32, %v1195_v31  ;;  %v2330_v47 = vcombine.high %v1195_v31, %v1209_v34  ;;  %v1300_v48 = vrot.slane %v1278_v38, %v2483_v12 }
  0x1e   : > { %v1319_v49 = vrot.slane %v1312_v39, %v2483_v12  ;;  %v1326_v50 = vrot.slane %v1210_v36, %v2483_v12  ;;  %v1381_v51 = vcombine.low %v1251_v35, %v1259_v37  ;;  %v1260_v52 = vcombine.high %v1244_v40, %v1244_v40 }
  0x1f   : > { %v1307_v53 = vrot.slane %v1279_v41, %v2483_v12  ;;  %v1309_v54 = vcombine.high %v1293_v42, %v1293_v42  ;;  %v1404_v55 = vcombine.low %v1244_v40, %v1258_v33  ;;  %v1342_v56 = vrot.slane %v1335_v44, %v2483_v12 }
  0x20   : > { %v1349_v57 = vrot.slane %v1209_v34, %v2483_v12  ;;  %v1427_v58 = vcombine.low %v1262_v43, %v1286_v46  ;;  %v1365_v59 = vrot.slane %v2330_v47, %v2483_v12  ;;  %v1372_v60 = vrot.slane %v1237_v28, %v2483_v12 }
  0x21   : > { %v1327_v61 = vcombine.low %v1319_v49, %v1326_v50  ;;  %v1388_v62 = vrot.slane %v1381_v51, %v2483_v12  ;;  %v1395_v63 = vrot.slane %v1261_v45, %v2483_v12  ;;  %v2331_v0 = vcombine.high %v1286_v46, %v1300_v48 }
  0x22   : > { %v1311_v1 = vcombine.high %v1307_v53, %v1307_v53  ;;  %v1411_v2 = vrot.slane %v1404_v55, %v2483_v12  ;;  %v1418_v3 = vrot.slane %v1260_v52, %v2483_v12  ;;  %v1473_v4 = vcombine.low %v1307_v53, %v1309_v54 }
  0x23   : > { %v1350_v5 = vcombine.low %v1342_v56, %v1349_v57  ;;  %v1434_v8 = vrot.slane %v1427_v58, %v2483_v12  ;;  %v1441_v10 = vrot.slane %v1300_v48, %v2483_v12  ;;  %v1373_v11 = vcombine.low %v1365_v59, %v1372_v60 }
  0x24   : > { %v1396_v14 = vcombine.low %v1388_v62, %v1395_v63  ;;  %v1457_v15 = vrot.slane %v2331_v0, %v2483_v12  ;;  %v1464_v16 = vrot.slane %v1293_v42, %v2483_v12  ;;  %v1334_v17 = vrot.slane %v1327_v61, %v2483_v12 }
  0x25   : > { %v1419_v18 = vcombine.low %v1411_v2, %v1418_v3  ;;  %v1480_v19 = vrot.slane %v1473_v4, %v2483_v12  ;;  %v1487_v20 = vrot.slane %v1311_v1, %v2483_v12  ;;  %v1357_v21 = vrot.slane %v1350_v5, %v2483_v12  ;;  %v315_v5 = vld [vmem:[%s306_s8] sm:$0xff] }
  0x26   : > { %v1442_v22 = vcombine.low %v1434_v8, %v1441_v10  ;;  %v1380_v23 = vrot.slane %v1373_v11, %v2483_v12  ;;  %v1403_v24 = vrot.slane %v1396_v14, %v2483_v12  ;;  %v1465_v25 = vcombine.low %v1457_v15, %v1464_v16 }
  0x27   : > { %v1426_v26 = vrot.slane %v1419_v18, %v2483_v12  ;;  %v1488_v27 = vcombine.low %v1480_v19, %v1487_v20  ;;  %v1504_v28 = vsel %vm1102_vm0, %v1334_v17, 0.0  ;;  %v1511_v30 = vsel %vm1102_vm0, %v1357_v21, 0.0 }
  0x28   : > { %v1449_v29 = vrot.slane %v1442_v22, %v2483_v12  ;;  %v1518_v31 = vsel %vm1102_vm0, %v1380_v23, 0.0  ;;  %v1472_v32 = vrot.slane %v1465_v25, %v2483_v12  ;;  %v1505_v33 = vrot.slane %v1504_v28, 4 }
  0x29   : > { %v1525_v34 = vsel %vm1102_vm0, %v1403_v24, 0.0  ;;  %v1495_v35 = vrot.slane %v1488_v27, %v2483_v12  ;;  %v1512_v36 = vrot.slane %v1511_v30, 4  ;;  %v1532_v37 = vsel %vm1102_vm0, %v1426_v26, 0.0 }
  0x2a   : > { %v1519_v38 = vrot.slane %v1518_v31, 4  ;;  %v1539_v39 = vsel %vm1102_vm0, %v1449_v29, 0.0  ;;  %v1526_v40 = vrot.slane %v1525_v34, 4  ;;  %v1506_v41 = vadd.f32 %v1505_v33, %v1504_v28 }
  0x2b   : > { %v1533_v42 = vrot.slane %v1532_v37, 4  ;;  %v1546_v43 = vsel %vm1102_vm0, %v1472_v32, 0.0  ;;  %v1513_v44 = vadd.f32 %v1512_v36, %v1511_v30  ;;  %v1540_v45 = vrot.slane %v1539_v39, 4 }
  0x2c   : > { %v1553_v46 = vsel %vm1102_vm0, %v1495_v35, 0.0  ;;  %v1520_v47 = vadd.f32 %v1519_v38, %v1518_v31  ;;  %v1527_v48 = vadd.f32 %v1526_v40, %v1525_v34  ;;  %v1547_v49 = vrot.slane %v1546_v43, 4 }
  0x2d   : > { %v1507_v50 = vrot.slane %v1506_v41, 2  ;;  %v1534_v51 = vadd.f32 %v1533_v42, %v1532_v37  ;;  %v1554_v52 = vrot.slane %v1553_v46, 4  ;;  %v1514_v53 = vrot.slane %v1513_v44, 2 }
  0x2e   : > { %v1541_v54 = vadd.f32 %v1540_v45, %v1539_v39  ;;  %v1521_v55 = vrot.slane %v1520_v47, 2  ;;  %v1528_v56 = vrot.slane %v1527_v48, 2  ;;  %v1548_v57 = vadd.f32 %v1547_v49, %v1546_v43 }
  0x2f   : > { %v1508_v58 = vadd.f32 %v1507_v50, %v1506_v41  ;;  %v1535_v59 = vrot.slane %v1534_v51, 2  ;;  %v1555_v60 = vadd.f32 %v1554_v52, %v1553_v46  ;;  %v1515_v61 = vadd.f32 %v1514_v53, %v1513_v44 }
  0x30   : > { %v1542_v62 = vrot.slane %v1541_v54, 2  ;;  %v1522_v63 = vadd.f32 %v1521_v55, %v1520_v47  ;;  %v1529_v0 = vadd.f32 %v1528_v56, %v1527_v48  ;;  %v1549_v1 = vrot.slane %v1548_v57, 2 }
  0x31   : > { %v1509_v2 = vrot.slane %v1508_v58, 1  ;;  %v1536_v3 = vadd.f32 %v1535_v59, %v1534_v51  ;;  %v1556_v4 = vrot.slane %v1555_v60, 2  ;;  %v1516_v8 = vrot.slane %v1515_v61, 1 }
  0x32   : > { %v1543_v10 = vadd.f32 %v1542_v62, %v1541_v54  ;;  %v1523_v11 = vrot.slane %v1522_v63, 1  ;;  %v1530_v14 = vrot.slane %v1529_v0, 1  ;;  %v1550_v15 = vadd.f32 %v1549_v1, %v1548_v57 }
  0x33   : > { %2365 = vrcp.f32 %v315_v5  ;;  %v1510_v16 = vadd.f32 %v1509_v2, %v1508_v58  ;;  %v1537_v17 = vrot.slane %v1536_v3, 1  ;;  %v1557_v18 = vadd.f32 %v1556_v4, %v1555_v60 }
  0x34   : > { %v1517_v19 = vadd.f32 %v1516_v8, %v1515_v61  ;;  %v1544_v20 = vrot.slane %v1543_v10, 1  ;;  %v1524_v21 = vadd.f32 %v1523_v11, %v1522_v63  ;;  %v1531_v22 = vadd.f32 %v1530_v14, %v1529_v0 }
  0x35   : > { %v1551_v23 = vrot.slane %v1550_v15, 1  ;;  %v1538_v24 = vadd.f32 %v1537_v17, %v1536_v3  ;;  %v1558_v25 = vrot.slane %v1557_v18, 1  ;;  %v1568_v26 = vadd.f32 1e-06, %v1510_v16 }
  0x36   : > { %v1545_v27 = vadd.f32 %v1544_v20, %v1543_v10  ;;  %v1569_v28 = vadd.f32 1e-06, %v1517_v19  ;;  %v1570_v30 = vadd.f32 1e-06, %v1524_v21  ;;  %v1827_v31 = vcombine.high %v2472_v6, %v2472_v6 }
  0x37   : > { %v1834_v32 = vrot.slane %v2472_v6, %v2483_v12  ;;  %v1552_v33 = vadd.f32 %v1551_v23, %v1550_v15  ;;  %v1571_v34 = vadd.f32 1e-06, %v1531_v22  ;;  %v1559_v35 = vadd.f32 %v1558_v25, %v1557_v18 }
  0x38   : > { %v1572_v36 = vadd.f32 1e-06, %v1538_v24  ;;  %2367 = vrcp.f32 %v1568_v26  ;;  %v1573_v38 = vadd.f32 1e-06, %v1545_v27  ;;  %v1841_v41 = vrot.slane %v1827_v31, %v2483_v12 }
  0x39   : > { %2369 = vrcp.f32 %v1569_v28  ;;  %v1842_v42 = vcombine.high %v1834_v32, %v1834_v32  ;;  %v1574_v44 = vadd.f32 1e-06, %v1552_v33  ;;  %v1575_v45 = vadd.f32 1e-06, %v1559_v35 }
  0x3a   : > { %2371 = vrcp.f32 %v1570_v30  ;;  %v1876_v46 = vcombine.high %v2474_v7, %v2474_v7  ;;  %v1883_v47 = vrot.slane %v2474_v7, %v2483_v12  ;;  %v1843_v49 = vcombine.high %v1841_v41, %v1841_v41 }
  0x3b   : > { %2373 = vrcp.f32 %v1571_v34  ;;  %v2553_v50 = vrot.slane %v1834_v32, %v2483_v12  ;;  %v2556_v51 = vrot.slane %v1841_v41, %v2483_v12  ;;  %v2559_v52 = vrot.slane %v1842_v42, %v2483_v12 }
  0x3c   : > { %2375 = vrcp.f32 %v1572_v36  ;;  %v384_v55 = vsub.s32 0, %v2476_v9  ;;  %v2564_v56 = vrot.slane %v1876_v46, %v2483_v12  ;;  %v1891_v57 = vcombine.high %v1883_v47, %v1883_v47 }
  0x3d   : > { %v2366_v39 = vpop.eup %2365  ;;  %2377 = vrcp.f32 %v1573_v38  ;;  %v1925_v58 = vcombine.high %v2485_v13, %v2485_v13  ;;  %v2572_v62 = vrot.slane %v2485_v13, %v2483_v12  ;;  %v2577_v9 = vrot.slane %v1843_v49, %v2483_v12 }
  0x3e   : > { %2379 = vrcp.f32 %v1574_v44  ;;  %v1872_v0 = vcombine.high %v2553_v50, %v2553_v50  ;;  %v1873_v1 = vcombine.high %v2556_v51, %v2556_v51  ;;  %v1874_v2 = vcombine.high %v2559_v52, %v2559_v52 }
  0x3f   : > { %2381 = vrcp.f32 %v1575_v45  ;;  %v1892_v15 = vcombine.high %v2564_v56, %v2564_v56  ;;  %v2594_v16 = vrot.slane %v1883_v47, %v2483_v12  ;;  %v2597_v17 = vrot.slane %v1891_v57, %v2483_v12 }
  0x40   : > { %v2606_v27 = vrot.slane %v1925_v58, %v2483_v12 }
  0x42   : > { %v2574_v63 = vpop.eup %2367 }
  0x43   : > { %v2585_v3 = vpop.eup %2369 }
  0x44   : > { %v2589_v11 = vpop.eup %2371 }
  0x45   : > { %v2599_v18 = vpop.eup %2373 }
  0x46   : > { %v2602_v23 = vpop.eup %2375 }
  0x47   : > { %v2608_v28 = vpop.eup %2377 }
  0x87   : > { %v320_v29 = vpop.permute.xlu0 %319 }
  0x88   : > { %v322_v37 = vsub.f32 %v315_v5, %v320_v29 }
  0x8b   : > { %v327_v40 = vpop.permute.xlu0 %326 }
  0x8c   : > { %v329_v43 = vmul.f32 %v327_v40, %v322_v37  ;;  %v2613_v37 = vpop.eup %2379 }
  0x8d   : > { %v2618_v42 = vpop.eup %2381 }
  0x8e   : > { %v331_v48 = vmul.f32 %v2366_v39, %v329_v43 }
  0x90   : > { %v333_v53 = vcombine.high %v331_v48, %v331_v48  ;;  %v340_v54 = vrot.slane %v331_v48, %v2483_v12 }
  0x92   : > { %v347_v59 = vrot.slane %v333_v53, %v2483_v12  ;;  %v348_v60 = vcombine.high %v340_v54, %v340_v54  ;;  %v356_v61 = vrot.slane %v340_v54, %v2483_v12 }
  0x94   : > { %v349_v4 = vcombine.high %v347_v59, %v347_v59  ;;  %v363_v5 = vrot.slane %v347_v59, %v2483_v12  ;;  %v370_v8 = vrot.slane %v348_v60, %v2483_v12  ;;  %v378_v10 = vcombine.high %v356_v61, %v356_v61 }
  0x95   : > { %v385_v14 = vrot.slane %v356_v61, %v384_v55 }
  0x96   : > { %v377_v19 = vrot.slane %v349_v4, %v2483_v12  ;;  %v379_v20 = vcombine.high %v363_v5, %v363_v5  ;;  %v380_v21 = vcombine.high %v370_v8, %v370_v8  ;;  %v389_v22 = vrot.slane %v370_v8, %v384_v55 }
  0x97   : > { %v393_v24 = vrot.slane %v378_v10, %v384_v55  ;;  %v401_v25 = vrot.slane %v363_v5, %v384_v55  ;;  %v420_v26 = vrot.slane %v385_v14, %v2483_v12 }
  0x98   : > { %v381_v29 = vcombine.high %v377_v19, %v377_v19  ;;  %v397_v30 = vrot.slane %v380_v21, %v384_v55  ;;  %v405_v31 = vrot.slane %v377_v19, %v384_v55  ;;  %v409_v32 = vrot.slane %v379_v20, %v384_v55 }
  0x99   : > { %v421_v33 = vcombine.high %v420_v26, %v420_v26  ;;  %v428_v34 = vrot.slane %v420_v26, %v2483_v12  ;;  %v443_v35 = vrot.slane %v389_v22, %v2483_v12  ;;  %v466_v36 = vrot.slane %v393_v24, %v2483_v12 }
  0x9a   : > { %v413_v38 = vrot.slane %v381_v29, %v384_v55  ;;  %v489_v39 = vrot.slane %v397_v30, %v2483_v12  ;;  %v512_v40 = vrot.slane %v401_v25, %v2483_v12  ;;  %v535_v41 = vrot.slane %v405_v31, %v2483_v12 }
  0x9b   : > { %v435_v43 = vrot.slane %v421_v33, %v2483_v12  ;;  %v436_v44 = vcombine.high %v428_v34, %v428_v34  ;;  %v444_v45 = vcombine.high %v443_v35, %v443_v35  ;;  %v451_v46 = vrot.slane %v443_v35, %v2483_v12 }
  0x9c   : > { %v467_v47 = vcombine.high %v466_v36, %v466_v36  ;;  %v474_v48 = vrot.slane %v466_v36, %v2483_v12  ;;  %v490_v49 = vcombine.high %v489_v39, %v489_v39  ;;  %v497_v53 = vrot.slane %v489_v39, %v2483_v12 }
  0x9d   : > { %v458_v54 = vrot.slane %v444_v45, %v2483_v12  ;;  %v459_v55 = vcombine.high %v451_v46, %v451_v46  ;;  %v513_v57 = vcombine.high %v512_v40, %v512_v40  ;;  %v520_v58 = vrot.slane %v512_v40, %v2483_v12 }
  0x9e   : > { %v481_v59 = vrot.slane %v467_v47, %v2483_v12  ;;  %v482_v60 = vcombine.high %v474_v48, %v474_v48  ;;  %v504_v61 = vrot.slane %v490_v49, %v2483_v12  ;;  %v505_v4 = vcombine.high %v497_v53, %v497_v53 }
  0x9f   : > { %v527_v5 = vrot.slane %v513_v57, %v2483_v12  ;;  %v528_v8 = vcombine.high %v520_v58, %v520_v58  ;;  %v536_v10 = vcombine.high %v535_v41, %v535_v41  ;;  %v543_v14 = vrot.slane %v535_v41, %v2483_v12 }
  0xa0   : > { %v558_v19 = vrot.slane %v409_v32, %v2483_v12  ;;  %v581_v20 = vrot.slane %v413_v38, %v2483_v12  ;;  %v601_v21 = vcombine.low %v428_v34, %v435_v43  ;;  %v602_v22 = vcombine.low %v436_v44, %v451_v46 }
  0xa1   : > { %v550_v24 = vrot.slane %v536_v10, %v2483_v12  ;;  %v551_v25 = vcombine.high %v543_v14, %v543_v14  ;;  %v603_v26 = vcombine.low %v458_v54, %v459_v55  ;;  %v604_v29 = vcombine.low %v474_v48, %v481_v59 }
  0xa2   : > { %v559_v30 = vcombine.high %v558_v19, %v558_v19  ;;  %v566_v31 = vrot.slane %v558_v19, %v2483_v12  ;;  %v582_v33 = vcombine.high %v581_v20, %v581_v20  ;;  %v589_v35 = vrot.slane %v581_v20, %v2483_v12  ;;  %v598_v20 = vld [vmem:[%s2645_s11] sm:$0xff] }
  0xa3   : > { %v611_v36 = vrot.slane %v601_v21, %v2483_v12  ;;  %v618_v32 = vrot.slane %v602_v22, %v2483_v12  ;;  %v625_v38 = vrot.slane %v603_v26, %v2483_v12  ;;  %v632_v34 = vrot.slane %v604_v29, %v2483_v12 }
  0xa4   : > { %v573_v39 = vrot.slane %v559_v30, %v2483_v12  ;;  %v574_v40 = vcombine.high %v566_v31, %v566_v31  ;;  %v596_v41 = vrot.slane %v582_v33, %v2483_v12  ;;  %v597_v43 = vcombine.high %v589_v35, %v589_v35 }
  0xa5   : > { %v633_v44 = vcombine.low %v611_v36, %v618_v32  ;;  %v634_v45 = vcombine.low %v625_v38, %v632_v34  ;;  %v650_v46 = vcombine.low %v482_v60, %v497_v53  ;;  %v651_v47 = vcombine.low %v504_v61, %v505_v4  ;;  %v599_v38 = vld [vmem:[%s2645_s11 + $0x8] sm:$0xff] }
  0xa6   : > { %v652_v48 = vcombine.low %v520_v58, %v527_v5  ;;  %v653_v49 = vcombine.low %v528_v8, %v543_v14  ;;  %v699_v54 = vcombine.low %v550_v24, %v551_v25  ;;  %v700_v55 = vcombine.low %v566_v31, %v573_v39 }
  0xa7   : > { %v641_v57 = vrot.slane %v633_v44, %v2483_v12  ;;  %v648_v59 = vrot.slane %v634_v45, %v2483_v12  ;;  %v660_v10 = vrot.slane %v650_v46, %v2483_v12  ;;  %v667_v19 = vrot.slane %v651_v47, %v2483_v12  ;;  %v600_v45 = vld [vmem:[%s2645_s11 + $0x10] sm:$0xff] }
  0xa8   : > { %v674_v21 = vrot.slane %v652_v48, %v2483_v12  ;;  %v681_v22 = vrot.slane %v653_v49, %v2483_v12  ;;  %v701_v26 = vcombine.low %v574_v40, %v589_v35  ;;  %v702_v53 = vcombine.low %v596_v41, %v597_v43 }
  0xa9   : > { %v649_v60 = vcombine.low %v641_v57, %v648_v59  ;;  %v682_v58 = vcombine.low %v660_v10, %v667_v19  ;;  %v709_v61 = vrot.slane %v699_v54, %v2483_v12  ;;  %v716_v4 = vrot.slane %v700_v55, %v2483_v12 }
  0xaa   : > { %v683_v5 = vcombine.low %v674_v21, %v681_v22  ;;  %v723_v8 = vrot.slane %v701_v26, %v2483_v12  ;;  %v730_v14 = vrot.slane %v702_v53, %v2483_v12  ;;  %v1875_v24 = vcombine.high %v2577_v9, %v2577_v9 }
  0xab   : > { %v690_v25 = vrot.slane %v682_v58, %v2483_v12  ;;  %v731_v29 = vcombine.low %v709_v61, %v716_v4  ;;  %v2661_v30 = vmul.f32 %v649_v60, %v598_v20  ;;  %v1940_v31 = vcombine.high %v2572_v62, %v2572_v62 }
  0xac   : > { %v697_v33 = vrot.slane %v683_v5, %v2483_v12  ;;  %v732_v35 = vcombine.low %v723_v8, %v730_v14  ;;  %v2668_v36 = vrot.slane %v2564_v56, %v2483_v12  ;;  %v2672_v32 = vrot.slane %v2572_v62, %v2483_v12 }
  0xad   : > { %v757_v34 = vmul.f32 %v2472_v6, %v2661_v30  ;;  %v2681_v39 = vrot.slane %v1892_v15, %v2483_v12  ;;  %v1921_v40 = vcombine.high %v2594_v16, %v2594_v16  ;;  %v1941_v41 = vcombine.high %v2606_v27, %v2606_v27 }
  0xae   : > { %v698_v43 = vcombine.low %v690_v25, %v697_v33  ;;  %v739_v62 = vrot.slane %v731_v29, %v2483_v12  ;;  %v746_v44 = vrot.slane %v732_v35, %v2483_v12  ;;  %v2691_v6 = vrot.slane %v2606_v27, %v2483_v12 }
  0xaf   : > { %v763_v46 = vcombine.high %v757_v34, %v757_v34  ;;  %v770_v56 = vrot.slane %v757_v34, %v2483_v12  ;;  %v1923_v15 = vcombine.high %v2597_v17, %v2597_v17  ;;  %v2698_v47 = vrot.slane %v1940_v31, %v2483_v12 }
  0xb0   : > { %v747_v48 = vcombine.low %v739_v62, %v746_v44  ;;  %v2700_v49 = vmul.f32 %v698_v43, %v599_v38  ;;  %v1922_v54 = vcombine.high %v2668_v36, %v2668_v36  ;;  %v1924_v10 = vcombine.high %v2681_v39, %v2681_v39 }
  0xb1   : > { %v777_v55 = vrot.slane %v763_v46, %v2483_v12  ;;  %v778_v57 = vcombine.high %v770_v56, %v770_v56  ;;  %v786_v59 = vrot.slane %v770_v56, %v2483_v12  ;;  %v2715_v21 = vrot.slane %v1941_v41, %v2483_v12 }
  0xb2   : > { %v2710_v19 = vmul.f32 %v747_v48, %v600_v45  ;;  %v758_v20 = vmul.f32 %v2474_v7, %v2700_v49 }
  0xb3   : > { %v779_v26 = vcombine.high %v777_v55, %v777_v55  ;;  %v800_v53 = vrot.slane %v778_v57, %v2483_v12  ;;  %v808_v60 = vcombine.high %v786_v59, %v786_v59  ;;  %v793_v4 = vrot.slane %v777_v55, %v2483_v12 }
  0xb4   : > { %v759_v61 = vmul.f32 %v2485_v13, %v2710_v19  ;;  %v812_v5 = vcombine.high %v758_v20, %v758_v20  ;;  %v819_v7 = vrot.slane %v758_v20, %v2483_v12 }
  0xb5   : > { %v807_v8 = vrot.slane %v779_v26, %v2483_v12  ;;  %v810_v14 = vcombine.high %v800_v53, %v800_v53  ;;  %v910_v25 = vcombine.low %v786_v59, %v800_v53  ;;  %v924_v29 = vrot.slane %v808_v60, %v2483_v12 }
  0xb6   : > { %v826_v31 = vrot.slane %v812_v5, %v2483_v12  ;;  %v827_v33 = vcombine.high %v819_v7, %v819_v7  ;;  %v835_v35 = vrot.slane %v819_v7, %v2483_v12  ;;  %v861_v38 = vcombine.high %v759_v61, %v759_v61 }
  0xb7   : > { %v868_v34 = vrot.slane %v759_v61, %v2483_v12  ;;  %v917_v13 = vrot.slane %v910_v25, %v2483_v12  ;;  %v933_v41 = vcombine.low %v810_v14, %v793_v4  ;;  %v947_v43 = vrot.slane %v807_v8, %v2483_v12 }
  0xb8   : > { %v828_v62 = vcombine.high %v826_v31, %v826_v31  ;;  %v842_v44 = vrot.slane %v826_v31, %v2483_v12  ;;  %v849_v45 = vrot.slane %v827_v33, %v2483_v12  ;;  %v857_v46 = vcombine.high %v835_v35, %v835_v35 }
  0xb9   : > { %v875_v56 = vrot.slane %v861_v38, %v2483_v12  ;;  %v876_v48 = vcombine.high %v868_v34, %v868_v34  ;;  %v884_v55 = vrot.slane %v868_v34, %v2483_v12  ;;  %v925_v57 = vcombine.low %v917_v13, %v924_v29 }
  0xba   : > { %v856_v59 = vrot.slane %v828_v62, %v2483_v12  ;;  %v858_v20 = vcombine.high %v842_v44, %v842_v44  ;;  %v859_v26 = vcombine.high %v849_v45, %v849_v45  ;;  %v940_v53 = vrot.slane %v933_v41, %v2483_v12 }
  0xbb   : > { %v877_v60 = vcombine.high %v875_v56, %v875_v56  ;;  %v891_v61 = vrot.slane %v875_v56, %v2483_v12  ;;  %v898_v5 = vrot.slane %v876_v48, %v2483_v12  ;;  %v932_v7 = vrot.slane %v925_v57, %v2483_v12 }
  0xbc   : > { %v860_v14 = vcombine.high %v856_v59, %v856_v59  ;;  %v948_v25 = vcombine.low %v940_v53, %v947_v43  ;;  %v2328_v31 = vcombine.high %v793_v4, %v807_v8  ;;  %v970_v33 = vrot.slane %v835_v35, %v2483_v12 }
  0xbd   : > { %v905_v29 = vrot.slane %v877_v60, %v2483_v12  ;;  %v907_v38 = vcombine.high %v891_v61, %v891_v61  ;;  %v979_v34 = vcombine.low %v849_v45, %v857_v46  ;;  %v993_v13 = vrot.slane %v859_v26, %v2483_v12 }
  0xbe   : > { %v955_v41 = vrot.slane %v948_v25, %v2483_v12  ;;  %v963_v62 = vrot.slane %v2328_v31, %v2483_v12  ;;  %v1002_v56 = vcombine.low %v842_v44, %v856_v59  ;;  %v1016_v48 = vrot.slane %v858_v20, %v2483_v12 }
  0xbf   : > { %v909_v22 = vcombine.high %v905_v29, %v905_v29  ;;  %v986_v57 = vrot.slane %v979_v34, %v2483_v12  ;;  %v1025_v43 = vcombine.low %v860_v14, %v884_v55  ;;  %v1039_v4 = vrot.slane %v898_v5, %v2483_v12 }
  0xc0   : > { %v971_v8 = vcombine.low %v963_v62, %v970_v33  ;;  %v1009_v35 = vrot.slane %v1002_v56, %v2483_v12  ;;  %v2329_v53 = vcombine.high %v884_v55, %v898_v5  ;;  %v1062_v45 = vrot.slane %v891_v61, %v2483_v12 }
  0xc1   : > { %v994_v46 = vcombine.low %v986_v57, %v993_v13  ;;  %v1032_v26 = vrot.slane %v1025_v43, %v2483_v12  ;;  %v1071_v60 = vcombine.low %v905_v29, %v907_v38  ;;  %v1085_v44 = vrot.slane %v909_v22, %v2483_v12 }
  0xc2   : > { %v978_v59 = vrot.slane %v971_v8, %v2483_v12  ;;  %v1017_v20 = vcombine.low %v1009_v35, %v1016_v48  ;;  %v1055_v25 = vrot.slane %v2329_v53, %v2483_v12  ;;  %v1103_v14 = vsel %vm1102_vm0, %v932_v7, 0.0 }
  0xc3   : > { %v1001_v31 = vrot.slane %v994_v46, %v2483_v12  ;;  %v1040_v33 = vcombine.low %v1032_v26, %v1039_v4  ;;  %v1078_v55 = vrot.slane %v1071_v60, %v2483_v12  ;;  %v1104_v5 = vrot.slane %v1103_v14, 4 }
  0xc4   : > { %v1024_v61 = vrot.slane %v1017_v20, %v2483_v12  ;;  %v1063_v34 = vcombine.low %v1055_v25, %v1062_v45  ;;  %v1110_v29 = vsel %vm1102_vm0, %v955_v41, 0.0  ;;  %v1117_v22 = vsel %vm1102_vm0, %v978_v59, 0.0 }
  0xc5   : > { %v1047_v38 = vrot.slane %v1040_v33, %v2483_v12  ;;  %v1086_v13 = vcombine.low %v1078_v55, %v1085_v44  ;;  %v1105_v62 = vadd.f32 %v1104_v5, %v1103_v14  ;;  %v1111_v56 = vrot.slane %v1110_v29, 4 }
  0xc6   : > { %v1070_v7 = vrot.slane %v1063_v34, %v2483_v12  ;;  %v1118_v48 = vrot.slane %v1117_v22, 4  ;;  %v1124_v57 = vsel %vm1102_vm0, %v1001_v31, 0.0  ;;  %v1131_v43 = vsel %vm1102_vm0, %v1024_v61, 0.0 }
  0xc7   : > { %v1093_v4 = vrot.slane %v1086_v13, %v2483_v12  ;;  %v1106_v8 = vrot.slane %v1105_v62, 2  ;;  %v1112_v35 = vadd.f32 %v1111_v56, %v1110_v29  ;;  %v1125_v53 = vrot.slane %v1124_v57, 4 }
  0xc8   : > { %v1119_v41 = vadd.f32 %v1118_v48, %v1117_v22  ;;  %v1132_v45 = vrot.slane %v1131_v43, 4  ;;  %v1138_v46 = vsel %vm1102_vm0, %v1047_v38, 0.0  ;;  %v1145_v26 = vsel %vm1102_vm0, %v1070_v7, 0.0 }
  0xc9   : > { %v1107_v60 = vadd.f32 %v1106_v8, %v1105_v62  ;;  %v1113_v44 = vrot.slane %v1112_v35, 2  ;;  %v1126_v59 = vadd.f32 %v1125_v53, %v1124_v57  ;;  %v1139_v20 = vrot.slane %v1138_v46, 4 }
  0xca   : > { %v1120_v25 = vrot.slane %v1119_v41, 2  ;;  %v1133_v14 = vadd.f32 %v1132_v45, %v1131_v43  ;;  %v1146_v31 = vrot.slane %v1145_v26, 4  ;;  %v1152_v33 = vsel %vm1102_vm0, %v1093_v4, 0.0 }
  0xcb   : > { %v1108_v55 = vrot.slane %v1107_v60, 1  ;;  %v1114_v5 = vadd.f32 %v1113_v44, %v1112_v35  ;;  %v1127_v61 = vrot.slane %v1126_v59, 2  ;;  %v1140_v34 = vadd.f32 %v1139_v20, %v1138_v46 }
  0xcc   : > { %v1121_v29 = vadd.f32 %v1120_v25, %v1119_v41  ;;  %v1134_v22 = vrot.slane %v1133_v14, 2  ;;  %v1147_v13 = vadd.f32 %v1146_v31, %v1145_v26  ;;  %v1153_v56 = vrot.slane %v1152_v33, 4 }
  0xcd   : > { %v1109_v38 = vadd.f32 %v1108_v55, %v1107_v60  ;;  %v1115_v48 = vrot.slane %v1114_v5, 1  ;;  %v1128_v7 = vadd.f32 %v1127_v61, %v1126_v59  ;;  %v1141_v62 = vrot.slane %v1140_v34, 2 }
  0xce   : > { %v1122_v8 = vrot.slane %v1121_v29, 1  ;;  %v1135_v57 = vadd.f32 %v1134_v22, %v1133_v14  ;;  %v1148_v53 = vrot.slane %v1147_v13, 2  ;;  %v1154_v58 = vadd.f32 %v1153_v56, %v1152_v33 }
  0xcf   : > { %v1116_v43 = vadd.f32 %v1115_v48, %v1114_v5  ;;  %v1129_v45 = vrot.slane %v1128_v7, 1  ;;  %v1142_v27 = vadd.f32 %v1141_v62, %v1140_v34  ;;  %vm1560_vm1 = vcmp.ge.f32.partialorder %v1109_v38, 0.0 }
  0xd0   : > { %v1123_v4 = vadd.f32 %v1122_v8, %v1121_v29  ;;  %v1136_v35 = vrot.slane %v1135_v57, 1  ;;  %v1149_v44 = vadd.f32 %v1148_v53, %v1147_v13  ;;  %v1155_v46 = vrot.slane %v1154_v58, 2 }
  0xd1   : > { %v1130_v41 = vadd.f32 %v1129_v45, %v1128_v7  ;;  %v1143_v20 = vrot.slane %v1142_v27, 1  ;;  %vm1561_vm2 = vcmp.ge.f32.partialorder %v1116_v43, 0.0  ;;  %v1577_v26 = vmul.f32 %v2574_v63, %v1109_v38 }
  0xd2   : > { %v1137_v60 = vadd.f32 %v1136_v35, %v1135_v57  ;;  %v1150_v59 = vrot.slane %v1149_v44, 1  ;;  %v1156_v25 = vadd.f32 %v1155_v46, %v1154_v58  ;;  %vm1562_vm3 = vcmp.ge.f32.partialorder %v1123_v4, 0.0 }
  0xd3   : > { %v1144_v14 = vadd.f32 %v1143_v20, %v1142_v27  ;;  %vm1563_vm4 = vcmp.ge.f32.partialorder %v1130_v41, 0.0  ;;  %v1579_v31 = vmul.f32 %v2585_v3, %v1116_v43  ;;  %v1581_v33 = vmul.f32 %v2589_v11, %v1123_v4 }
  0xd4   : > { %v1151_v55 = vadd.f32 %v1150_v59, %v1149_v44  ;;  %v1157_v5 = vrot.slane %v1156_v25, 1  ;;  %vm1564_vm5 = vcmp.ge.f32.partialorder %v1137_v60, 0.0  ;;  %v1583_v61 = vmul.f32 %v2599_v18, %v1130_v41 }
  0xd5   : > { %vm1565_vm6 = vcmp.ge.f32.partialorder %v1144_v14, 0.0  ;;  %v1585_v34 = vmul.f32 %v2602_v23, %v1137_v60  ;;  %v1587_v63 = vmul.f32 %v2608_v28, %v1144_v14  ;;  %v1592_v29 = vsel %vm1560_vm1, 0.0, %v1577_v26 }
  0xd6   : > { %v1158_v58 = vadd.f32 %v1157_v5, %v1156_v25  ;;  %vm1566_vm7 = vcmp.ge.f32.partialorder %v1151_v55, 0.0  ;;  %v1589_v27 = vmul.f32 %v2613_v37, %v1151_v55  ;;  %v1593_v3 = vsel %vm1561_vm2, 0.0, %v1579_v31 }
  0xd7   : > { %v1594_v11 = vsel %vm1562_vm3, 0.0, %v1581_v33  ;;  %v1595_v22 = vsel %vm1563_vm4, 0.0, %v1583_v61  ;;  %v1596_v13 = vsel %vm1564_vm5, 0.0, %v1585_v34  ;;  %v1597_v56 = vsel %vm1565_vm6, 0.0, %v1587_v63 }
  0xd8   : > { %vm1567_vm8 = vcmp.ge.f32.partialorder %v1158_v58, 0.0  ;;  %v1591_v18 = vmul.f32 %v2618_v42, %v1158_v58  ;;  %v1598_v23 = vsel %vm1566_vm7, 0.0, %v1589_v27  ;;  %v1600_v48 = vmul.f32 0.8, %v1592_v29 }
  0xd9   : > { %v1601_v28 = vmul.f32 0.8, %v1593_v3  ;;  %v1602_v38 = vmul.f32 0.8, %v1594_v11  ;;  %v1603_v7 = vmul.f32 0.8, %v1595_v22  ;;  %v1973_v62 = vcombine.high %v2715_v21, %v2715_v21 }
  0xda   : > { %v1599_v37 = vsel %vm1567_vm8, 0.0, %v1591_v18  ;;  %v1604_v8 = vmul.f32 0.8, %v1596_v13  ;;  %v1605_v57 = vmul.f32 0.8, %v1597_v56  ;;  %v1622_v53 = vrot.slane %v1600_v48, %v2483_v12 }
  0xdb   : > { %v1606_v43 = vmul.f32 0.8, %v1598_v23  ;;  %v1607_v45 = vmul.f32 0.8, %v1599_v37  ;;  %v1645_v4 = vrot.slane %v1601_v28, %v2483_v12  ;;  %v1668_v35 = vrot.slane %v1602_v38, %v2483_v12 }
  0xdc   : > { %v1623_v42 = vcombine.high %v1622_v53, %v1622_v53  ;;  %v1630_v44 = vrot.slane %v1622_v53, %v2483_v12  ;;  %v1691_v46 = vrot.slane %v1603_v7, %v2483_v12  ;;  %v1714_v41 = vrot.slane %v1604_v8, %v2483_v12 }
  0xdd   : > { %v1646_v20 = vcombine.high %v1645_v4, %v1645_v4  ;;  %v1653_v26 = vrot.slane %v1645_v4, %v2483_v12  ;;  %v1669_v60 = vcombine.high %v1668_v35, %v1668_v35  ;;  %v1676_v59 = vrot.slane %v1668_v35, %v2483_v12 }
  0xde   : > { %v1637_v25 = vrot.slane %v1623_v42, %v2483_v12  ;;  %v1638_v14 = vcombine.high %v1630_v44, %v1630_v44  ;;  %v1692_v31 = vcombine.high %v1691_v46, %v1691_v46  ;;  %v1699_v33 = vrot.slane %v1691_v46, %v2483_v12 }
  0xdf   : > { %v1660_v55 = vrot.slane %v1646_v20, %v2483_v12  ;;  %v1661_v5 = vcombine.high %v1653_v26, %v1653_v26  ;;  %v1683_v61 = vrot.slane %v1669_v60, %v2483_v12  ;;  %v1684_v34 = vcombine.high %v1676_v59, %v1676_v59 }
  0xe0   : > { %v1706_v63 = vrot.slane %v1692_v31, %v2483_v12  ;;  %v1707_v29 = vcombine.high %v1699_v33, %v1699_v33  ;;  %v1715_v58 = vcombine.high %v1714_v41, %v1714_v41  ;;  %v1722_v27 = vrot.slane %v1714_v41, %v2483_v12 }
  0xe1   : > { %v1737_v3 = vrot.slane %v1605_v57, %v2483_v12  ;;  %v1760_v11 = vrot.slane %v1606_v43, %v2483_v12  ;;  %v1783_v22 = vrot.slane %v1607_v45, %v2483_v12  ;;  %v1998_v13 = vmul.f32 %v2553_v50, %v1630_v44 }
  0xe2   : > { %v1729_v56 = vrot.slane %v1715_v58, %v2483_v12  ;;  %v1730_v18 = vcombine.high %v1722_v27, %v1722_v27  ;;  %v1999_v23 = vmul.f32 %v2559_v52, %v1637_v25  ;;  %v2000_v48 = vmul.f32 %v1872_v0, %v1638_v14 }
  0xe3   : > { %v1738_v28 = vcombine.high %v1737_v3, %v1737_v3  ;;  %v1745_v38 = vrot.slane %v1737_v3, %v2483_v12  ;;  %v1761_v7 = vcombine.high %v1760_v11, %v1760_v11  ;;  %v1768_v37 = vrot.slane %v1760_v11, %v2483_v12 }
  0xe4   : > { %v1784_v8 = vcombine.high %v1783_v22, %v1783_v22  ;;  %v1791_v57 = vrot.slane %v1783_v22, %v2483_v12  ;;  %v2001_v53 = vmul.f32 %v1874_v2, %v1653_v26  ;;  %v2002_v43 = vmul.f32 %v2556_v51, %v1660_v55 }
  0xe5   : > { %v1752_v45 = vrot.slane %v1738_v28, %v2483_v12  ;;  %v1753_v4 = vcombine.high %v1745_v38, %v1745_v38  ;;  %v1775_v50 = vrot.slane %v1761_v7, %v2483_v12  ;;  %v1776_v0 = vcombine.high %v1768_v37, %v1768_v37 }
  0xe6   : > { %v1798_v35 = vrot.slane %v1784_v8, %v2483_v12  ;;  %v1799_v42 = vcombine.high %v1791_v57, %v1791_v57  ;;  %v2003_v44 = vmul.f32 %v2577_v9, %v1661_v5  ;;  %v2004_v46 = vmul.f32 %v1873_v1, %v1676_v59 }
  0xe7   : > { %v2005_v52 = vmul.f32 %v1875_v24, %v1683_v61  ;;  %v2006_v2 = vmul.f32 %v2594_v16, %v1684_v34  ;;  %v2007_v41 = vmul.f32 %v2597_v17, %v1699_v33  ;;  %v2008_v20 = vmul.f32 %v1921_v40, %v1706_v63 }
  0xe8   : > { %v2009_v26 = vmul.f32 %v1923_v15, %v1707_v29  ;;  %v2010_v60 = vmul.f32 %v2668_v36, %v1722_v27  ;;  %v2011_v51 = vmul.f32 %v2681_v39, %v1729_v56  ;;  %v2012_v9 = vmul.f32 %v1922_v54, %v1730_v18 }
  0xe9   : > { %v2013_v1 = vmul.f32 %v1924_v10, %v1745_v38  ;;  %v2014_v24 = vmul.f32 %v2672_v32, %v1752_v45  ;;  %v2015_v16 = vmul.f32 %v2698_v47, %v1753_v4  ;;  %v2896_v17 = vcombine.high %v2672_v32, %v2672_v32 }
  0xea   : > { %v2897_v15 = vcombine.high %v2698_v47, %v2698_v47  ;;  %v2018_v25 = vmul.f32 %v2691_v6, %v1776_v0  ;;  %v2019_v36 = vmul.f32 %v2715_v21, %v1791_v57  ;;  %v2898_v39 = vcombine.high %v2691_v6, %v2691_v6 }
  0xeb   : > { %v2016_v40 = vmul.f32 %v2896_v17, %v1768_v37  ;;  %v2021_v10 = vmul.f32 %v1973_v62, %v1799_v42  ;;  %v2046_v14 = vcombine.low %v1998_v13, %v1999_v23  ;;  %v2047_v31 = vcombine.low %v2000_v48, %v2001_v53 }
  0xec   : > { %v2017_v59 = vmul.f32 %v2897_v15, %v1775_v50  ;;  %v2020_v54 = vmul.f32 %v2898_v39, %v1798_v35  ;;  %v2048_v32 = vcombine.low %v2002_v43, %v2003_v44  ;;  %v2049_v33 = vcombine.low %v2004_v46, %v2005_v52 }
  0xed   : > { %v2095_v55 = vcombine.low %v2006_v2, %v2007_v41  ;;  %v2096_v5 = vcombine.low %v2008_v20, %v2009_v26  ;;  %v2097_v47 = vcombine.low %v2010_v60, %v2011_v51  ;;  %v2056_v61 = vrot.slane %v2046_v14, %v2483_v12 }
  0xee   : > { %v2063_v34 = vrot.slane %v2047_v31, %v2483_v12  ;;  %v2070_v63 = vrot.slane %v2048_v32, %v2483_v12  ;;  %v2098_v29 = vcombine.low %v2012_v9, %v2013_v1  ;;  %v2077_v6 = vrot.slane %v2049_v33, %v2483_v12 }
  0xef   : > { %v2105_v58 = vrot.slane %v2095_v55, %v2483_v12  ;;  %v2112_v21 = vrot.slane %v2096_v5, %v2483_v12  ;;  %v2119_v62 = vrot.slane %v2097_v47, %v2483_v12  ;;  %v2144_v11 = vcombine.low %v2014_v24, %v2015_v16 }
  0xf0   : > { %v2078_v27 = vcombine.low %v2056_v61, %v2063_v34  ;;  %v2126_v3 = vrot.slane %v2098_v29, %v2483_v12  ;;  %v2145_v22 = vcombine.low %v2016_v40, %v2017_v59  ;;  %v2079_v13 = vcombine.low %v2070_v63, %v2077_v6 }
  0xf1   : > { %v2127_v56 = vcombine.low %v2105_v58, %v2112_v21  ;;  %v2146_v18 = vcombine.low %v2018_v25, %v2019_v36  ;;  %v2147_v23 = vcombine.low %v2020_v54, %v2021_v10  ;;  %v2154_v28 = vrot.slane %v2144_v11, %v2483_v12 }
  0xf2   : > { %v2128_v48 = vcombine.low %v2119_v62, %v2126_v3  ;;  %v2161_v38 = vrot.slane %v2145_v22, %v2483_v12  ;;  %v2086_v7 = vrot.slane %v2078_v27, %v2483_v12  ;;  %v2093_v37 = vrot.slane %v2079_v13, %v2483_v12 }
  0xf3   : > { %v2168_v8 = vrot.slane %v2146_v18, %v2483_v12  ;;  %v2175_v57 = vrot.slane %v2147_v23, %v2483_v12  ;;  %v2135_v53 = vrot.slane %v2127_v56, %v2483_v12 }
  0xf4   : > { %v2142_v43 = vrot.slane %v2128_v48, %v2483_v12  ;;  %v2176_v45 = vcombine.low %v2154_v28, %v2161_v38  ;;  %v2094_v4 = vcombine.low %v2086_v7, %v2093_v37 }
  0xf5   : > { %v2177_v50 = vcombine.low %v2168_v8, %v2175_v57 }
  0xf6   : > { %v2143_v0 = vcombine.low %v2135_v53, %v2142_v43  ;;  %v2184_v35 = vrot.slane %v2176_v45, %v2483_v12  ;;  %v2196_v44 = vsub.f32 %v2661_v30, %v2094_v4 }
  0xf7   : > { %v2191_v42 = vrot.slane %v2177_v50, %v2483_v12 }
  0xf8   : > { %v2197_v46 = vsub.f32 %v2700_v49, %v2143_v0  ;;  %2200 = vst.msk [vmem:[%s314_s14] sm:$0xff] %vm2199_vm9, %v2196_v44 }
  0xf9   : > { %v2192_v52 = vcombine.low %v2184_v35, %v2191_v42 }
  0xfa   : > { %2201 = vst.msk [vmem:[%s314_s14 + $0x8] sm:$0xff] %vm2199_vm9, %v2197_v46 }
  0xfb   : > { %v2198_v2 = vsub.f32 %v2710_v19, %v2192_v52 }
  0xfd   : > { %2202 = vst.msk [vmem:[%s314_s14 + $0x10] sm:$0xff] %vm2199_vm9, %v2198_v2 }
  0xfe PF: > { %s15_s20 = sadd.s32 1, %s2405_s20   ;;  %s2899_s18 = smov %s2401_s19 }
  0xff   : > { %p12_p5 = scmp.ge.s32.totalorder %s15_s20, 4   ;;  %s2900_s19 = smov %s2902_s21 }
 0x101   :  { %14 = sbr.rel (!%p12_p5) target bundleno = 2 (0x2), region = 76 }

</bundles_post_ra>
